<compile_context>
chip_gen: v7x
topology: tpu7x:2x2x1
jax: 0.10.0
libtpu: 0.0.40
codegen_flags: <defaults>
</compile_context>

<pallas_src>
import functools

import jax
import jax.numpy as jnp
from jax.experimental import pallas as pl
from jax.experimental.pallas import tpu as pltpu

EPS = 1e-7  # clamp floor, matches the torch STFT-loss reference


# ----------------------------- Pallas kernel --------------------------------


def _stft_loss_kernel(xf_ref, yf_ref, basis_ref, out_ref, *, kp):
    """Row tile -> windowed DFT (MXU), magnitudes, per-lane partial sums.

    out_ref block is (1, 3, kp) f32, resident across the reduction axis:
      row 0: sum over rows of (y_mag - x_mag)^2
      row 1: sum over rows of clamp(|Y|^2, eps)
      row 2: sum over rows of |log y_mag - log x_mag|
    """
    i = pl.program_id(1)

    @pl.when(i == 0)
    def _():
        out_ref[...] = jnp.zeros_like(out_ref)

    basis = basis_ref[...]                                    # (n_fft, 2*kp) bf16
    xz = jnp.dot(xf_ref[...], basis, preferred_element_type=jnp.float32)
    yz = jnp.dot(yf_ref[...], basis, preferred_element_type=jnp.float32)

    xr, xi = xz[:, :kp], xz[:, kp:]                           # lane-aligned slices
    yr, yi = yz[:, :kp], yz[:, kp:]

    x_sq = jnp.maximum(xr * xr + xi * xi, EPS)
    y_sq = jnp.maximum(yr * yr + yi * yi, EPS)
    x_mag = jnp.sqrt(x_sq)
    y_mag = jnp.sqrt(y_sq)

    diff = y_mag - x_mag
    logdiff = jnp.abs(jnp.log(y_mag) - jnp.log(x_mag))

    # Sublane-only reductions; lanes stay resident in the VMEM accumulator.
    out_ref[0, 0:1, :] += jnp.sum(diff * diff, axis=0, keepdims=True)
    out_ref[0, 1:2, :] += jnp.sum(y_sq, axis=0, keepdims=True)
    out_ref[0, 2:3, :] += jnp.sum(logdiff, axis=0, keepdims=True)


def _pallas_stft_partials(x_frames, y_frames, basis, n_par, tiles_per_core, tile_m):
    m_pad, n_fft = x_frames.shape
    kp2 = basis.shape[1]
    kp = kp2 // 2

    kernel = functools.partial(_stft_loss_kernel, kp=kp)

    def frame_map(p, i):
        return (p * tiles_per_core + i, 0)

    return pl.pallas_call(
        kernel,
        out_shape=jax.ShapeDtypeStruct((n_par, 3, kp), jnp.float32),
        grid_spec=pltpu.PrefetchScalarGridSpec(
            num_scalar_prefetch=0,
            grid=(n_par, tiles_per_core),
            in_specs=[
                pl.BlockSpec((tile_m, n_fft), frame_map),
                pl.BlockSpec((tile_m, n_fft), frame_map),
                # Constant index_map: fetched once, re-used every step.
                pl.BlockSpec((n_fft, kp2), lambda p, i: (0, 0)),
            ],
            out_specs=pl.BlockSpec((1, 3, kp), lambda p, i: (p, 0, 0)),
        ),
        compiler_params=pltpu.CompilerParams(
            dimension_semantics=("parallel", "arbitrary"),
            vmem_limit_bytes=48 * 1024 * 1024,
        ),
    )(x_frames, y_frames, basis)


# ------------------------------- JAX glue ------------------------------------


def _hann_window(win_length):
    # torch.hann_window(win_length), periodic=True
    n = jnp.arange(win_length, dtype=jnp.float32)
    return 0.5 - 0.5 * jnp.cos(2.0 * jnp.pi * n / win_length)


def _dft_basis(n_fft, win_length, k_pad):
    """Fused [cos | -sin] windowed DFT basis, (n_fft, 2*k_pad), bf16."""
    win = _hann_window(win_length)
    lp = (n_fft - win_length) // 2
    rp = n_fft - win_length - lp
    win_full = jnp.pad(win, (lp, rp))          # torch.stft centers the window
    k_real = n_fft // 2 + 1
    n = jnp.arange(n_fft, dtype=jnp.float32)[:, None]
    k = jnp.arange(k_real, dtype=jnp.float32)[None, :]
    ang = 2.0 * jnp.pi * n * k / n_fft
    cos_mat = win_full[:, None] * jnp.cos(ang)                 # real-part basis
    sin_mat = -win_full[:, None] * jnp.sin(ang)                # imag-part basis
    cos_mat = jnp.pad(cos_mat, ((0, 0), (0, k_pad - k_real)))
    sin_mat = jnp.pad(sin_mat, ((0, 0), (0, k_pad - k_real)))
    return jnp.concatenate([cos_mat, sin_mat], axis=1).astype(jnp.bfloat16)


def _frame_signal(x, n_fft, hop):
    # torch.stft default: center=True, pad_mode='reflect'
    # TODO(synk): framing could be moved in-kernel (pl.ANY + manual DMA of
    # overlapping windows) to avoid the ~n_fft/hop HBM duplication of frames.
    pad = n_fft // 2
    x_pad = jnp.pad(x, ((0, 0), (pad, pad)), mode="reflect")
    t_pad = x_pad.shape[1]
    n_frames = 1 + (t_pad - n_fft) // hop
    idx = jnp.arange(n_frames)[:, None] * hop + jnp.arange(n_fft)[None, :]
    return x_pad[:, idx]                        # (B, n_frames, n_fft)


def stft_loss(x, y, fft_size=1024, shift_size=120, win_length=600,
              tile_m=256, n_par=2):
    """Returns (sc_loss, mag_loss) matching the torch STFTLoss.forward."""
    x = x.astype(jnp.float32)
    y = y.astype(jnp.float32)
    b = x.shape[0]

    xf = _frame_signal(x, fft_size, shift_size)
    yf = _frame_signal(y, fft_size, shift_size)
    n_frames = xf.shape[1]
    m_real = b * n_frames

    xf = xf.reshape(m_real, fft_size)
    yf = yf.reshape(m_real, fft_size)

    total_tiles = max(1, -(-m_real // tile_m))
    total_tiles = -(-total_tiles // n_par) * n_par      # multiple of n_par
    tiles_per_core = total_tiles // n_par
    m_pad = total_tiles * tile_m

    xf = jnp.pad(xf, ((0, m_pad - m_real), (0, 0))).astype(jnp.bfloat16)
    yf = jnp.pad(yf, ((0, m_pad - m_real), (0, 0))).astype(jnp.bfloat16)

    k_real = fft_size // 2 + 1
    kp = -(-k_real // 128) * 128
    basis = _dft_basis(fft_size, win_length, kp)

    partials = _pallas_stft_partials(xf, yf, basis, n_par, tiles_per_core, tile_m)
    sums = jnp.sum(partials, axis=(0, 2))               # (3,)

    # Padded rows / padded bins contribute exactly 0 to sums[0] and sums[2],
    # and exactly EPS (the clamp floor) each to sums[1]; correct analytically.
    pad_elems = m_pad * kp - m_real * k_real
    y2 = sums[1] - jnp.float32(EPS) * jnp.float32(pad_elems)

    # spectral convergence: ||y_mag - x_mag||_F / ||y_mag||_F
    sc_loss = jnp.sqrt(sums[0]) / jnp.sqrt(y2)
    # log-STFT magnitude: mean |log y_mag - log x_mag|
    mag_loss = sums[2] / jnp.float32(m_real * k_real)
    return sc_loss, mag_loss


def combine_pfp_loss(x, y, weight=2000.0, **stft_kwargs):
    """CombinePFPLoss.forward: spectral loss (+ weight * perceptual loss)."""
    sc_loss, mag_loss = stft_loss(x, y, **stft_kwargs)
    loss = sc_loss + mag_loss
    # TODO(synk): PerceptualLoss (pretrained wav2vec / Hubert feature network)
    # has no Pallas equivalent without shipping pretrained weights; omitted.
    del weight
    return loss


# --------------------------------- demo --------------------------------------

if __name__ == "__main__":
    key = jax.random.PRNGKey(0)
    kx, ky = jax.random.split(key)

    # Small, consistent shapes: (B, T) 1-D signals; scaled-down STFT params.
    B, T = 2, 512
    x = jax.random.normal(kx, (B, T), dtype=jnp.float32)
    y = jax.random.normal(ky, (B, T), dtype=jnp.float32)

    loss = combine_pfp_loss(
        x, y, fft_size=128, shift_size=32, win_length=64, tile_m=256, n_par=2
    )
    jax.block_until_ready(loss)
    print("KERNEL_OK")
</pallas_src>

<mosaic_0001>
module attributes {stable_mosaic.version = 11 : i64} {
  func.func @_stft_loss_kernel(%arg0: i32, %arg1: i32, %arg2: memref<256x128xbf16, #tpu.memory_space<vmem>>, %arg3: memref<256x128xbf16, #tpu.memory_space<vmem>>, %arg4: memref<128x256xbf16, #tpu.memory_space<vmem>>, %arg5: memref<1x3x128xf32, #tpu.memory_space<vmem>>) attributes {dimension_semantics = [#tpu.dimension_semantics<parallel>, #tpu.dimension_semantics<arbitrary>], iteration_bounds = array<i64: 2, 1>, scalar_prefetch = 0 : i64, scratch_operands = 0 : i64, tpu.core_type = #tpu.core_type<tc>, window_params = [{transform_indices = @transform_0, window_bounds = array<i64: 256, 128>}, {transform_indices = @transform_1, window_bounds = array<i64: 256, 128>}, {pipeline_mode = #tpu.pipeline_mode<synchronous>, transform_indices = @transform_2, window_bounds = array<i64: 128, 256>}, {transform_indices = @transform_3, window_bounds = array<i64: 1, 3, 128>}]} {
    %c0_i32 = arith.constant 0 : i32
    %0 = arith.cmpi eq, %arg1, %c0_i32 : i32
    %1 = arith.extui %0 : i1 to i32
    %c0_i32_0 = arith.constant 0 : i32
    %2 = arith.cmpi ne, %1, %c0_i32_0 : i32
    scf.if %2 {
      %cst_28 = arith.constant 0.000000e+00 : f32
      %54 = vector.broadcast %cst_28 : f32 to vector<1x3x128xf32>
      %c0_29 = arith.constant 0 : index
      %c0_30 = arith.constant 0 : index
      %c0_31 = arith.constant 0 : index
      %55 = vector.load %arg5[%c0_29, %c0_30, %c0_31] : memref<1x3x128xf32, #tpu.memory_space<vmem>>, vector<1x3x128xf32>
      tpu.vector_store %arg5[%c0_29, %c0_30, %c0_31], %54 {strides = array<i32>} : memref<1x3x128xf32, #tpu.memory_space<vmem>>, vector<1x3x128xf32>,
    } else {
    }
    %c0 = arith.constant 0 : index
    %c0_1 = arith.constant 0 : index
    %3 = vector.load %arg4[%c0, %c0_1] : memref<128x256xbf16, #tpu.memory_space<vmem>>, vector<128x256xbf16>
    %c0_2 = arith.constant 0 : index
    %c0_3 = arith.constant 0 : index
    %4 = vector.load %arg2[%c0_2, %c0_3] : memref<256x128xbf16, #tpu.memory_space<vmem>>, vector<256x128xbf16>
    %cst = arith.constant dense<0.000000e+00> : vector<256x256xf32>
    %5 = tpu.matmul %4, %3, %cst {dimension_numbers = #tpu.dot_dimension_numbers<[1], [0], [0], [1], [0, 0, 1, 1], [], []>} : vector<256x128xbf16>, vector<128x256xbf16>, vector<256x256xf32> -> vector<256x256xf32>
    %c0_4 = arith.constant 0 : index
    %c0_5 = arith.constant 0 : index
    %6 = vector.load %arg3[%c0_4, %c0_5] : memref<256x128xbf16, #tpu.memory_space<vmem>>, vector<256x128xbf16>
    %cst_6 = arith.constant dense<0.000000e+00> : vector<256x256xf32>
    %7 = tpu.matmul %6, %3, %cst_6 {dimension_numbers = #tpu.dot_dimension_numbers<[1], [0], [0], [1], [0, 0, 1, 1], [], []>} : vector<256x128xbf16>, vector<128x256xbf16>, vector<256x256xf32> -> vector<256x256xf32>
    %8 = vector.extract_strided_slice %5 {offsets = [0, 0], sizes = [256, 128], strides = [1, 1]} : vector<256x256xf32> to vector<256x128xf32>
    %9 = vector.extract_strided_slice %5 {offsets = [0, 128], sizes = [256, 128], strides = [1, 1]} : vector<256x256xf32> to vector<256x128xf32>
    %10 = vector.extract_strided_slice %7 {offsets = [0, 0], sizes = [256, 128], strides = [1, 1]} : vector<256x256xf32> to vector<256x128xf32>
    %11 = vector.extract_strided_slice %7 {offsets = [0, 128], sizes = [256, 128], strides = [1, 1]} : vector<256x256xf32> to vector<256x128xf32>
    %12 = arith.mulf %8, %8 : vector<256x128xf32>
    %13 = arith.mulf %9, %9 : vector<256x128xf32>
    %14 = arith.addf %12, %13 : vector<256x128xf32>
    %cst_7 = arith.constant 1.000000e-07 : f32
    %15 = vector.broadcast %cst_7 : f32 to vector<256x128xf32>
    %16 = arith.maximumf %14, %15 : vector<256x128xf32>
    %17 = arith.mulf %10, %10 : vector<256x128xf32>
    %18 = arith.mulf %11, %11 : vector<256x128xf32>
    %19 = arith.addf %17, %18 : vector<256x128xf32>
    %cst_8 = arith.constant 1.000000e-07 : f32
    %20 = vector.broadcast %cst_8 : f32 to vector<256x128xf32>
    %21 = arith.maximumf %19, %20 : vector<256x128xf32>
    %22 = math.sqrt %16 : vector<256x128xf32>
    %23 = math.sqrt %21 : vector<256x128xf32>
    %24 = arith.subf %23, %22 : vector<256x128xf32>
    %25 = math.log %23 : vector<256x128xf32>
    %26 = math.log %22 : vector<256x128xf32>
    %27 = arith.subf %25, %26 : vector<256x128xf32>
    %28 = math.absf %27 : vector<256x128xf32>
    %c0_9 = arith.constant 0 : index
    %c0_10 = arith.constant 0 : index
    %c0_11 = arith.constant 0 : index
    %29 = vector.load %arg5[%c0_9, %c0_10, %c0_11] : memref<1x3x128xf32, #tpu.memory_space<vmem>>, vector<1x1x128xf32>
    %30 = vector.shape_cast %29 : vector<1x1x128xf32> to vector<1x128xf32>
    %31 = arith.mulf %24, %24 : vector<256x128xf32>
    %cst_12 = arith.constant dense<0.000000e+00> : vector<128xf32>
    %32 = vector.multi_reduction <add>, %31, %cst_12 [0] : vector<256x128xf32> to vector<128xf32>
    %33 = vector.shape_cast %32 : vector<128xf32> to vector<1x128xf32>
    %34 = arith.addf %30, %33 : vector<1x128xf32>
    %c0_13 = arith.constant 0 : index
    %c0_14 = arith.constant 0 : index
    %c0_15 = arith.constant 0 : index
    %35 = vector.load %arg5[%c0_13, %c0_14, %c0_15] : memref<1x3x128xf32, #tpu.memory_space<vmem>>, vector<1x1x128xf32>
    %36 = vector.shape_cast %35 : vector<1x1x128xf32> to vector<1x128xf32>
    %37 = vector.shape_cast %34 : vector<1x128xf32> to vector<1x1x128xf32>
    tpu.vector_store %arg5[%c0_13, %c0_14, %c0_15], %37 {strides = array<i32>} : memref<1x3x128xf32, #tpu.memory_space<vmem>>, vector<1x1x128xf32>,
    %c0_16 = arith.constant 0 : index
    %c1 = arith.constant 1 : index
    %c0_17 = arith.constant 0 : index
    %38 = vector.load %arg5[%c0_16, %c1, %c0_17] : memref<1x3x128xf32, #tpu.memory_space<vmem>>, vector<1x1x128xf32>
    %39 = vector.shape_cast %38 : vector<1x1x128xf32> to vector<1x128xf32>
    %cst_18 = arith.constant dense<0.000000e+00> : vector<128xf32>
    %40 = vector.multi_reduction <add>, %21, %cst_18 [0] : vector<256x128xf32> to vector<128xf32>
    %41 = vector.shape_cast %40 : vector<128xf32> to vector<1x128xf32>
    %42 = arith.addf %39, %41 : vector<1x128xf32>
    %c0_19 = arith.constant 0 : index
    %c1_20 = arith.constant 1 : index
    %c0_21 = arith.constant 0 : index
    %43 = vector.load %arg5[%c0_19, %c1_20, %c0_21] : memref<1x3x128xf32, #tpu.memory_space<vmem>>, vector<1x1x128xf32>
    %44 = vector.shape_cast %43 : vector<1x1x128xf32> to vector<1x128xf32>
    %45 = vector.shape_cast %42 : vector<1x128xf32> to vector<1x1x128xf32>
    tpu.vector_store %arg5[%c0_19, %c1_20, %c0_21], %45 {strides = array<i32>} : memref<1x3x128xf32, #tpu.memory_space<vmem>>, vector<1x1x128xf32>,
    %c0_22 = arith.constant 0 : index
    %c2 = arith.constant 2 : index
    %c0_23 = arith.constant 0 : index
    %46 = vector.load %arg5[%c0_22, %c2, %c0_23] : memref<1x3x128xf32, #tpu.memory_space<vmem>>, vector<1x1x128xf32>
    %47 = vector.shape_cast %46 : vector<1x1x128xf32> to vector<1x128xf32>
    %cst_24 = arith.constant dense<0.000000e+00> : vector<128xf32>
    %48 = vector.multi_reduction <add>, %28, %cst_24 [0] : vector<256x128xf32> to vector<128xf32>
    %49 = vector.shape_cast %48 : vector<128xf32> to vector<1x128xf32>
    %50 = arith.addf %47, %49 : vector<1x128xf32>
    %c0_25 = arith.constant 0 : index
    %c2_26 = arith.constant 2 : index
    %c0_27 = arith.constant 0 : index
    %51 = vector.load %arg5[%c0_25, %c2_26, %c0_27] : memref<1x3x128xf32, #tpu.memory_space<vmem>>, vector<1x1x128xf32>
    %52 = vector.shape_cast %51 : vector<1x1x128xf32> to vector<1x128xf32>
    %53 = vector.shape_cast %50 : vector<1x128xf32> to vector<1x1x128xf32>
    tpu.vector_store %arg5[%c0_25, %c2_26, %c0_27], %53 {strides = array<i32>} : memref<1x3x128xf32, #tpu.memory_space<vmem>>, vector<1x1x128xf32>,
    return
  }
  func.func @transform_0(%arg0: i32, %arg1: i32) -> (i32, i32) {
    %c1_i32 = arith.constant 1 : i32
    %0 = arith.muli %arg0, %c1_i32 : i32
    %1 = arith.addi %0, %arg1 : i32
    %c0_i32 = arith.constant 0 : i32
    %c0_i32_0 = arith.constant 0 : i32
    return %1, %c0_i32 : i32, i32
  }
  func.func @transform_1(%arg0: i32, %arg1: i32) -> (i32, i32) {
    %c1_i32 = arith.constant 1 : i32
    %0 = arith.muli %arg0, %c1_i32 : i32
    %1 = arith.addi %0, %arg1 : i32
    %c0_i32 = arith.constant 0 : i32
    %c0_i32_0 = arith.constant 0 : i32
    return %1, %c0_i32 : i32, i32
  }
  func.func @transform_2(%arg0: i32, %arg1: i32) -> (i32, i32) {
    %c0_i32 = arith.constant 0 : i32
    %c0_i32_0 = arith.constant 0 : i32
    %c0_i32_1 = arith.constant 0 : i32
    return %c0_i32, %c0_i32_0 : i32, i32
  }
  func.func @transform_3(%arg0: i32, %arg1: i32) -> (i32, i32, i32) {
    %c0_i32 = arith.constant 0 : i32
    %c0_i32_0 = arith.constant 0 : i32
    %c0_i32_1 = arith.constant 0 : i32
    return %arg0, %c0_i32, %c0_i32_0 : i32, i32, i32
  }
}

</mosaic_0001>

<bundles_post_ra>
// kernel: tpu_custom_call.1
= control target key start
LH: loop header
LB: loop body
LE: loop exit
PB: predicated region body
PF: predicated region fallthrough
CT: control target
= control target key end

     0   :  { %8 = vsyncpa [#allocation3], 0  ;;  %s4287_s0 = inlined_call_operand.hbm [shape: bf16[512,128], index: 0, kind: input, shape index: {}]   ;;  %s4288_s1 = inlined_call_operand.hbm [shape: bf16[512,128], index: 1, kind: input, shape index: {}]   ;;  %s4289_s2 = inlined_call_operand.hbm [shape: bf16[128,256], index: 2, kind: input, shape index: {}]   ;;  %s4290_s3 = inlined_call_operand.vmem [shape: f32[2,3,128], index: 3, kind: output, shape index: {}]  }
   0x1   :  { %10 = vsyncpa [#allocation3 + $0x1], 0 }
   0x2   :  { %11 = vsyncpa [#allocation5], 0 }
   0x3   :  { %13 = vsyncpa [#allocation5 + $0x1], 0  ;;  %s2830_s12 = smov 0   ;;  %s2832_s13 = smov 0  }
   0x4   :  { %s2834_s14 = smov 0   ;;  %s2836_s15 = smov 0  }
   0x5   :  { %s2838_s16 = smov 0   ;;  %s2840_s17 = smov 0  }
   0x6 LB: > { %s2196_s18 = sadd.s32 4294967295, %s2799_s17   ;;  %p53_p0 = scmp.ne.s32.totalorder %s2783_s13, %s2779_s12  ;;  %s2799_s17 = sphi %s2840_s17, %s19_s17   ;;  %s2795_s16 = sphi %s2838_s16, %s4351_s16   ;;  %s2791_s15 = sphi %s2836_s15, %s4350_s15   ;;  %s2787_s14 = sphi %s2834_s14, %s4349_s14   ;;  %s2783_s13 = sphi %s2832_s13, %s4348_s13   ;;  %s2779_s12 = sphi %s2830_s12, %s4347_s12  }
   0x7   : > { %p2862_p1 = scmp.eq.s32.totalorder %s2196_s18, 0  ;;  %p2198_p2 = scmp.ge.s32.totalorder %s2799_s17, 1 }
   0x8   : > { %p139_p3 = scmp.lt.s32.totalorder %s2799_s17, 3  ;;  %s2801_s22 = smov [#allocation6]  }
   0x9   : > { %s4295_s19 = scalar_select %p2862_p1, 1, 0 }
   0xa   : > { %p2870_p4 = por %p2862_p1, %p53_p0  ;;  %p2874_p5 = pnand %p2198_p2, %p139_p3 }
   0xb   : > { %s151_s23 = sshll.u32 %s2801_s22, 4  ;;  %s31_s25 = sadd.s32 1, %s2795_s16  ;;  %s152_s23 = int_to_ptr.vmem [resolvable:$true] %s151_s23 }
   0xc   : > { %s4296_s20 = scalar_select %p2870_p4, 1, 0 }
   0xd   : > { %s4297_s21 = scalar_select %p2874_p5, 1, 0 }
   0xe   : > { %p2272_p6 = pneg %p2874_p5  ;;  %s2653_s28 = scalar_lea.hbm %s4289_s2, 2048 }
   0xf   : > { %p2654_p8 = scmp.ne.s32.totalorder %s4289_s2, %s2653_s28  ;;  %p2660_p12 = scmp.lt.u32.totalorder %s2653_s28, %s4289_s2 }
  0x10   : > { %p2882_p7 = pnand %p2272_p6, %p2862_p1 }
  0x12   : > { %p2655_p9 = pneg %p2882_p7 }
  0x14   : > { %p2656_p10 = pnand %p2655_p9, %p2654_p8 }
  0x16   : > { %p2657_p11 = pneg %p2656_p10 }
  0x18   : > { %p2662_p13 = pnand %p2660_p12, %p2657_p11 }
  0x1a   : > { %2665 = shalt.err (!%p2662_p13)
}
  0x1b   : > { %s2666_s6 = scalar_lea.vmem %s152_s23, 2048  ;;  %p2674_p6 = scmp.lt.s32.totalorder %s152_s23, %s152_s23 }
  0x1c   : > { %p2667_p0 = scmp.ne.s32.totalorder %s152_s23, %s2666_s6  ;;  %p2675_p1 = scmp.lt.s32.totalorder %s2666_s6, %s2666_s6 }
  0x1e   : > { %p2669_p2 = pnand %p2667_p0, %p2655_p9  ;;  %p2676_p4 = por %p2675_p1, %p2674_p6 }
  0x20   : > { %p2670_p3 = pneg %p2669_p2 }
  0x22   : > { %p2677_p5 = pnand %p2676_p4, %p2670_p3 }
  0x24   : > { %2680 = shalt.err (!%p2677_p5)
}
  0x25   : > { %s2802_s7 = smov 128   ;;  %s2803_s8 = smov 8  }
  0x26   : > { %2275 = dma.hbm_to_vmem [thread:$0]  (!%p2882_p7), %s4289_s2, 2048, %s152_s23, [#allocation5], %s2802_s7, %s2802_s7, %s2803_s8  }
  0x27   : > { %p33_p1 = scmp.ge.s32.totalorder %s31_s25, 2  ;;  %s40_s11 = sadd.s32 1, %s2787_s14 }
  0x28   : > { %p47_p4 = scmp.ne.s32.totalorder %s2787_s14, %s2783_s13  ;;  %p48_p5 = scmp.eq.s32.totalorder %s2799_s17, 0 }
  0x29   : > { %s4353_s25 = smov (%p33_p1, %s31_s25), 0  ;;  %p2284_p9 = scmp.lt.s32.totalorder %s2799_s17, 2 }
  0x2a   : > { %p49_p8 = por %p48_p5, %p47_p4  ;;  %s37_s12 = ssub.s32 %s2795_s16, %s4353_s25 }
  0x2b   : > { %s165_s22 = sand.u32 1, %s2787_s14   ;;  %p38_p10 = scmp.eq.s32.totalorder %s37_s12, 0 }
  0x2c   : > { %s2913_s26 = sshll.u32 %s165_s22, 7  ;;  %s2262_s24 = sshll.u32 %s2795_s16, 11 }
  0x2d   : > { %s2917_s27 = scalar_select %p38_p10, %s2787_s14, %s40_s11  }
  0x2e   : > { %s2924_s29 = scalar_lea.hbm %s4287_s0, %s2262_s24  ;;  %s169_s30 = scalar_lea.vmem [#allocation2], %s2913_s26 }
  0x2f   : > { %s177_s4 = sshll.u32 %s169_s30, 4  ;;  %p2927_p7 = pnand %p2284_p9, %p49_p8  ;;  %s2931_s4 = int_to_ptr.vmem [resolvable:$true] %s177_s4 }
  0x30   : > { %s2933_s6 = scalar_lea.sflag [#allocation3], %s165_s22  ;;  %s2681_s7 = scalar_lea.hbm %s2924_s29, 2048 }
  0x31   : > { %p2682_p11 = scmp.ne.s32.totalorder %s2924_s29, %s2681_s7  ;;  %p2683_p12 = pneg %p2927_p7 }
  0x32   : > { %s2686_s10 = scalar_lea.hbm %s4287_s0, 4096  ;;  %p2687_p2 = scmp.lt.u32.totalorder %s2924_s29, %s4287_s0 }
  0x33   : > { %p2684_p13 = pnand %p2683_p12, %p2682_p11  ;;  %p2688_p3 = scmp.lt.u32.totalorder %s2686_s10, %s2681_s7 }
  0x34   : > { %p2690_p1 = scmp.lt.u32.totalorder %s2681_s7, %s2924_s29 }
  0x35   : > { %p2685_p0 = pneg %p2684_p13  ;;  %p2689_p6 = por %p2688_p3, %p2687_p2 }
  0x37   : > { %p2691_p4 = por %p2690_p1, %p2689_p6 }
  0x39   : > { %p2692_p5 = pnand %p2691_p4, %p2685_p0 }
  0x3b   : > { %2695 = shalt.err (!%p2692_p5)
}
  0x3c   : > { %s2696_s22 = scalar_lea.vmem %s2931_s4, 2048  ;;  %s2804_s23 = smov [#allocation2]  }
  0x3d   : > { %p2697_p8 = scmp.ne.s32.totalorder %s2931_s4, %s2696_s22  ;;  %s2701_s28 = sshll.u32 %s2804_s23, 4  ;;  %s2702_s28 = int_to_ptr.vmem [resolvable:$false] %s2701_s28 }
  0x3e   : > { %s2703_s30 = scalar_lea.vmem %s2702_s28, 4096  ;;  %p2704_p11 = scmp.lt.s32.totalorder %s2931_s4, %s2702_s28 }
  0x3f   : > { %p2699_p9 = pnand %p2697_p8, %p2683_p12  ;;  %p2705_p13 = scmp.lt.s32.totalorder %s2703_s30, %s2696_s22 }
  0x41   : > { %p2700_p10 = pneg %p2699_p9  ;;  %p2706_p2 = por %p2705_p13, %p2704_p11 }
  0x43   : > { %p2707_p3 = pnand %p2706_p2, %p2700_p10 }
  0x45   : > { %2710 = shalt.err (!%p2707_p3)
}
  0x46   : > { %s2805_s7 = smov 64   ;;  %s2806_s8 = smov 4  }
  0x47   : > { %2279 = dma.hbm_to_vmem [thread:$0]  (!%p2927_p7), %s2924_s29, 2048, %s2931_s4, %s2933_s6, %s2805_s7, %s2805_s7, %s2806_s8  }
  0x48   : > { %s2969_s11 = scalar_lea.hbm %s4288_s1, %s2262_s24  ;;  %s191_s12 = scalar_lea.vmem [#allocation4], %s2913_s26 }
  0x49   : > { %s199_s22 = sshll.u32 %s191_s12, 4  ;;  %s187_s23 = sand.u32 1, %s2799_s17   ;;  %s2973_s22 = int_to_ptr.vmem [resolvable:$true] %s199_s22 }
  0x4a   : > { %s2975_s28 = scalar_lea.sflag [#allocation5], %s187_s23  ;;  %s2711_s30 = scalar_lea.hbm %s2969_s11, 2048 }
  0x4b   : > { %p2712_p0 = scmp.ne.s32.totalorder %s2969_s11, %s2711_s30  ;;  %s2716_s4 = scalar_lea.hbm %s4288_s1, 4096 }
  0x4c   : > { %p2717_p4 = scmp.lt.u32.totalorder %s2969_s11, %s4288_s1  ;;  %p2718_p5 = scmp.lt.u32.totalorder %s2716_s4, %s2711_s30 }
  0x4d   : > { %p2714_p6 = pnand %p2712_p0, %p2683_p12  ;;  %p2720_p9 = scmp.lt.u32.totalorder %s2711_s30, %s2969_s11 }
  0x4e   : > { %p2719_p8 = por %p2718_p5, %p2717_p4 }
  0x4f   : > { %p2715_p1 = pneg %p2714_p6 }
  0x50   : > { %p2721_p10 = por %p2720_p9, %p2719_p8 }
  0x52   : > { %p2722_p11 = pnand %p2721_p10, %p2715_p1 }
  0x54   : > { %2725 = shalt.err (!%p2722_p11)
}
  0x55   : > { %s2726_s26 = scalar_lea.vmem %s2973_s22, 2048  ;;  %s2807_s10 = smov [#allocation4]  }
  0x56   : > { %p2727_p13 = scmp.ne.s32.totalorder %s2973_s22, %s2726_s26  ;;  %s2731_s12 = sshll.u32 %s2807_s10, 4  ;;  %s2732_s12 = int_to_ptr.vmem [resolvable:$false] %s2731_s12 }
  0x57   : > { %s2733_s23 = scalar_lea.vmem %s2732_s12, 4096  ;;  %p2734_p0 = scmp.lt.s32.totalorder %s2973_s22, %s2732_s12 }
  0x58   : > { %p2729_p2 = pnand %p2727_p13, %p2683_p12  ;;  %p2735_p6 = scmp.lt.s32.totalorder %s2733_s23, %s2726_s26 }
  0x5a   : > { %p2730_p3 = pneg %p2729_p2  ;;  %p2736_p4 = por %p2735_p6, %p2734_p0 }
  0x5c   : > { %p2737_p5 = pnand %p2736_p4, %p2730_p3 }
  0x5e   : > { %2740 = shalt.err (!%p2737_p5)
}
  0x5f   : > { %2282 = dma.hbm_to_vmem [thread:$0]  (!%p2927_p7), %s2969_s11, 2048, %s2973_s22, %s2975_s28, %s2805_s7, %s2805_s7, %s2806_s8  }
  0x60   : > { %p4300_p12 = scmp.ne.s32.totalorder %s4297_s21, 0 }
  0x62   : > { %211 = sbr.rel (%p4300_p12) target bundleno = 665 (0x299), region = 32 }
  0x69   : > { %s213_s30 = sand.u32 1, %s2783_s13   ;;  %p4301_p1 = scmp.ne.s32.totalorder %s4296_s20, 0 }
  0x6a   : > { %s2208_s29 = sshll.u32 %s213_s30, 7  ;;  %s214_s24 = scalar_lea.sflag [#allocation3], %s213_s30 }
  0x6b   : > { %s3007_s4 = scalar_lea.vmem [#allocation2], %s2208_s29 }
  0x6c   : > { %2766 = dma.done.wait (%p4301_p1), %s214_s24, 2048  }
  0x6d   : > { %2768 = vsyncadd (%p4301_p1), %s214_s24, 4294965248  ;;  %s222_s5 = sand.u32 1, %s2196_s18   ;;  %s3015_s8 = scalar_lea.vmem [#allocation4], %s2208_s29 }
  0x6e   : > { %s223_s7 = scalar_lea.sflag [#allocation5], %s222_s5 }
  0x6f   : > { %2770 = dma.done.wait (%p4301_p1), %s223_s7, 2048  }
  0x70   : > { %2772 = vsyncadd (%p4301_p1), %s223_s7, 4294965248  ;;  %p4302_p7 = scmp.ne.s32.totalorder %s4295_s19, 0 }
  0x72   : > { %2774 = dma.done.wait (%p4302_p7), [#allocation5], 2048  }
  0x73   : > { %2776 = vsyncadd (%p4302_p7), [#allocation5], 4294965248  ;;  %v2808_v0 = vmov 0   ;;  %v2341_v1 = vld [vmem:[#allocation6 + $0x4] ss:$8 sps:$4 sm:$0xff]   ;;  %v2369_v21 = vld [vmem:[%s3007_s4 + $0x10] sm:$0xff]  }
  0x74   : > { %527 = vmatprep.mubr.bf16.mxu0 %v2808_v0  ;;  %848 = vmatprep.mubr.bf16.mxu1 %v2808_v0  ;;  %v2343_v2 = vld [vmem:[#allocation6] ss:$8 sps:$4 sm:$0xff]   ;;  %v2344_v3 = vld [vmem:[#allocation6 + $0x14] ss:$8 sps:$4 sm:$0xff]   ;;  %v2346_v4 = vld [vmem:[#allocation6 + $0x10] ss:$8 sps:$4 sm:$0xff]  }
  0x75   : > { %495 = vmatprep.subr.bf16.mxu0 %v2341_v1  ;;  %816 = vmatprep.subr.bf16.mxu1 %v2341_v1  ;;  %v2347_v5 = vld [vmem:[#allocation6 + $0x24] ss:$8 sps:$4 sm:$0xff]   ;;  %v2349_v6 = vld [vmem:[#allocation6 + $0x20] ss:$8 sps:$4 sm:$0xff]   ;;  %v2350_v7 = vld [vmem:[#allocation6 + $0x34] ss:$8 sps:$4 sm:$0xff]  }
  0x76   : > { %496 = vmatpush1.bf16.msra.mxu0 %v2343_v2  ;;  %817 = vmatpush1.bf16.msra.mxu1 %v2343_v2  ;;  %v2352_v8 = vld [vmem:[#allocation6 + $0x30] ss:$8 sps:$4 sm:$0xff]   ;;  %v2353_v9 = vld [vmem:[#allocation6 + $0x44] ss:$8 sps:$4 sm:$0xff]   ;;  %v2355_v10 = vld [vmem:[#allocation6 + $0x40] ss:$8 sps:$4 sm:$0xff]  }
  0x77   : > { %497 = vmatprep.subr.bf16.mxu0 %v2344_v3  ;;  %818 = vmatprep.subr.bf16.mxu1 %v2344_v3  ;;  %v2356_v11 = vld [vmem:[#allocation6 + $0x54] ss:$8 sps:$4 sm:$0xff]   ;;  %v2358_v12 = vld [vmem:[#allocation6 + $0x50] ss:$8 sps:$4 sm:$0xff]   ;;  %v2359_v13 = vld [vmem:[#allocation6 + $0x64] ss:$8 sps:$4 sm:$0xff]  }
  0x78   : > { %v2361_v14 = vld [vmem:[#allocation6 + $0x60] ss:$8 sps:$4 sm:$0xff]   ;;  %v2362_v15 = vld [vmem:[#allocation6 + $0x74] ss:$8 sps:$4 sm:$0xff]   ;;  %v2364_v16 = vld [vmem:[#allocation6 + $0x70] ss:$8 sps:$4 sm:$0xff]  }
  0x79   : > { %v2365_v17 = vld [vmem:[%s3007_s4] sm:$0xff]   ;;  %v2367_v19 = vld [vmem:[%s3007_s4 + $0x8] sm:$0xff]   ;;  %v2370_v22 = vld [vmem:[%s3015_s8 + $0x10] sm:$0xff]   ;;  %p261_p8 = scmp.lt.s32.totalorder %s2791_s15, 1 }
  0x7a   : > { %498 = vmatpush1.bf16.msra.mxu0 %v2346_v4  ;;  %819 = vmatpush1.bf16.msra.mxu1 %v2346_v4  ;;  %v2366_v18 = vld [vmem:[%s3015_s8] sm:$0xff]   ;;  %v2368_v20 = vld [vmem:[%s3015_s8 + $0x8] sm:$0xff]   ;;  %v2371_v23 = vld [vmem:[%s3007_s4 + $0x18] sm:$0xff]  }
  0x7b   : > { %499 = vmatprep.subr.bf16.mxu0 %v2347_v5  ;;  %820 = vmatprep.subr.bf16.mxu1 %v2347_v5  ;;  %v2372_v24 = vld [vmem:[%s3015_s8 + $0x18] sm:$0xff]   ;;  %v2373_v25 = vld [vmem:[%s3007_s4 + $0x20] sm:$0xff]   ;;  %v2375_v27 = vld [vmem:[%s3007_s4 + $0x28] sm:$0xff]   ;;  %s4355_s15 = smov (!%p261_p8, %s2791_s15), 1 }
  0x7c   : > { %v2374_v26 = vld [vmem:[%s3015_s8 + $0x20] sm:$0xff]   ;;  %v2376_v28 = vld [vmem:[%s3015_s8 + $0x28] sm:$0xff]   ;;  %v2377_v29 = vld [vmem:[%s3007_s4 + $0x30] sm:$0xff]   ;;  %s2211_s18 = sshll.u32 %s4355_s15, 2 }
  0x7d   : > { %v2378_v30 = vld [vmem:[%s3015_s8 + $0x30] sm:$0xff]   ;;  %v2379_v31 = vld [vmem:[%s3007_s4 + $0x38] sm:$0xff]   ;;  %v2381_v33 = vld [vmem:[%s3007_s4 + $0x40] sm:$0xff]   ;;  %s4220_s20 = scalar_lea.vmem %s4290_s3, %s2211_s18 }
  0x7e   : > { %500 = vmatpush1.bf16.msra.mxu0 %v2349_v6  ;;  %821 = vmatpush1.bf16.msra.mxu1 %v2349_v6  ;;  %v2380_v32 = vld [vmem:[%s3015_s8 + $0x38] sm:$0xff]   ;;  %v2382_v34 = vld [vmem:[%s3015_s8 + $0x40] sm:$0xff]   ;;  %v2383_v35 = vld [vmem:[%s3007_s4 + $0x48] sm:$0xff]  }
  0x7f   : > { %501 = vmatprep.subr.bf16.mxu0 %v2350_v7  ;;  %822 = vmatprep.subr.bf16.mxu1 %v2350_v7  ;;  %v2384_v36 = vld [vmem:[%s3015_s8 + $0x48] sm:$0xff]   ;;  %v2385_v37 = vld [vmem:[%s3007_s4 + $0x50] sm:$0xff]   ;;  %v2387_v39 = vld [vmem:[%s3007_s4 + $0x58] sm:$0xff]  }
  0x80   : > { %v2386_v38 = vld [vmem:[%s3015_s8 + $0x50] sm:$0xff]   ;;  %v2388_v40 = vld [vmem:[%s3015_s8 + $0x58] sm:$0xff]   ;;  %v2389_v41 = vld [vmem:[%s3007_s4 + $0x60] sm:$0xff]  }
  0x81   : > { %v2390_v42 = vld [vmem:[%s3015_s8 + $0x60] sm:$0xff]   ;;  %v2391_v43 = vld [vmem:[%s3007_s4 + $0x68] sm:$0xff]   ;;  %v2393_v45 = vld [vmem:[%s3007_s4 + $0x70] sm:$0xff]  }
  0x82   : > { %502 = vmatpush1.bf16.msra.mxu0 %v2352_v8  ;;  %823 = vmatpush1.bf16.msra.mxu1 %v2352_v8  ;;  %v2392_v44 = vld [vmem:[%s3015_s8 + $0x68] sm:$0xff]   ;;  %v2394_v46 = vld [vmem:[%s3015_s8 + $0x70] sm:$0xff]   ;;  %v2395_v47 = vld [vmem:[%s3007_s4 + $0x78] sm:$0xff]  }
  0x83   : > { %503 = vmatprep.subr.bf16.mxu0 %v2353_v9  ;;  %824 = vmatprep.subr.bf16.mxu1 %v2353_v9  ;;  %v2396_v48 = vld [vmem:[%s3015_s8 + $0x78] sm:$0xff]  }
  0x86   : > { %504 = vmatpush1.bf16.msra.mxu0 %v2355_v10  ;;  %825 = vmatpush1.bf16.msra.mxu1 %v2355_v10 }
  0x87   : > { %505 = vmatprep.subr.bf16.mxu0 %v2356_v11  ;;  %826 = vmatprep.subr.bf16.mxu1 %v2356_v11 }
  0x8a   : > { %506 = vmatpush1.bf16.msra.mxu0 %v2358_v12  ;;  %827 = vmatpush1.bf16.msra.mxu1 %v2358_v12 }
  0x8b   : > { %507 = vmatprep.subr.bf16.mxu0 %v2359_v13  ;;  %828 = vmatprep.subr.bf16.mxu1 %v2359_v13 }
  0x8e   : > { %508 = vmatpush1.bf16.msra.mxu0 %v2361_v14  ;;  %829 = vmatpush1.bf16.msra.mxu1 %v2361_v14 }
  0x8f   : > { %509 = vmatprep.subr.bf16.mxu0 %v2362_v15  ;;  %830 = vmatprep.subr.bf16.mxu1 %v2362_v15 }
  0x92   : > { %510 = vmatpush1.bf16.msra.mxu0 %v2364_v16  ;;  %831 = vmatpush1.bf16.msra.mxu1 %v2364_v16 }
  0x95   : > { %528 = vmatmul.mubr.bf16.vlgmr.msra.gmra.mrb[0].mxu0 %v2365_v17  ;;  %849 = vmatmul.mubr.bf16.vlgmr.msra.gmra.mrb[0].mxu1 %v2366_v18 }
  0x96   : > { %537 = vmatprep.mubr.bf16.mxu0 %v2808_v0  ;;  %858 = vmatprep.mubr.bf16.mxu1 %v2808_v0 }
  0x9d   : > { %538 = vmatmul.mubr.bf16.gmra.mrb[4].mxu0 %v2367_v19  ;;  %859 = vmatmul.mubr.bf16.gmra.mrb[4].mxu1 %v2368_v20 }
  0x9e   : > { %547 = vmatprep.mubr.bf16.mxu0 %v2808_v0  ;;  %868 = vmatprep.mubr.bf16.mxu1 %v2808_v0 }
  0xa5   : > { %548 = vmatmul.mubr.bf16.gmra.mrb[8].mxu0 %v2369_v21  ;;  %869 = vmatmul.mubr.bf16.gmra.mrb[8].mxu1 %v2370_v22 }
  0xa6   : > { %557 = vmatprep.mubr.bf16.mxu0 %v2808_v0  ;;  %878 = vmatprep.mubr.bf16.mxu1 %v2808_v0 }
  0xad   : > { %558 = vmatmul.mubr.bf16.gmra.mrb[12].mxu0 %v2371_v23  ;;  %879 = vmatmul.mubr.bf16.gmra.mrb[12].mxu1 %v2372_v24 }
  0xae   : > { %567 = vmatprep.mubr.bf16.mxu0 %v2808_v0  ;;  %888 = vmatprep.mubr.bf16.mxu1 %v2808_v0 }
  0xb5   : > { %568 = vmatmul.mubr.bf16.gmra.mrb[16].mxu0 %v2373_v25  ;;  %889 = vmatmul.mubr.bf16.gmra.mrb[16].mxu1 %v2374_v26 }
  0xb6   : > { %577 = vmatprep.mubr.bf16.mxu0 %v2808_v0  ;;  %898 = vmatprep.mubr.bf16.mxu1 %v2808_v0 }
  0xbd   : > { %578 = vmatmul.mubr.bf16.gmra.mrb[20].mxu0 %v2375_v27  ;;  %899 = vmatmul.mubr.bf16.gmra.mrb[20].mxu1 %v2376_v28 }
  0xbe   : > { %587 = vmatprep.mubr.bf16.mxu0 %v2808_v0  ;;  %908 = vmatprep.mubr.bf16.mxu1 %v2808_v0 }
  0xc5   : > { %588 = vmatmul.mubr.bf16.gmra.mrb[24].mxu0 %v2377_v29  ;;  %909 = vmatmul.mubr.bf16.gmra.mrb[24].mxu1 %v2378_v30 }
  0xc6   : > { %597 = vmatprep.mubr.bf16.mxu0 %v2808_v0  ;;  %918 = vmatprep.mubr.bf16.mxu1 %v2808_v0 }
  0xcd   : > { %598 = vmatmul.mubr.bf16.gmra.mrb[28].mxu0 %v2379_v31  ;;  %919 = vmatmul.mubr.bf16.gmra.mrb[28].mxu1 %v2380_v32 }
  0xce   : > { %607 = vmatprep.mubr.bf16.mxu0 %v2808_v0  ;;  %928 = vmatprep.mubr.bf16.mxu1 %v2808_v0 }
  0xd5   : > { %608 = vmatmul.mubr.bf16.gmra.mrb[32].mxu0 %v2381_v33  ;;  %929 = vmatmul.mubr.bf16.gmra.mrb[32].mxu1 %v2382_v34 }
  0xd6   : > { %617 = vmatprep.mubr.bf16.mxu0 %v2808_v0  ;;  %938 = vmatprep.mubr.bf16.mxu1 %v2808_v0 }
  0xdd   : > { %618 = vmatmul.mubr.bf16.gmra.mrb[36].mxu0 %v2383_v35  ;;  %939 = vmatmul.mubr.bf16.gmra.mrb[36].mxu1 %v2384_v36 }
  0xde   : > { %627 = vmatprep.mubr.bf16.mxu0 %v2808_v0  ;;  %948 = vmatprep.mubr.bf16.mxu1 %v2808_v0 }
  0xe5   : > { %628 = vmatmul.mubr.bf16.gmra.mrb[40].mxu0 %v2385_v37  ;;  %949 = vmatmul.mubr.bf16.gmra.mrb[40].mxu1 %v2386_v38 }
  0xe6   : > { %637 = vmatprep.mubr.bf16.mxu0 %v2808_v0  ;;  %958 = vmatprep.mubr.bf16.mxu1 %v2808_v0 }
  0xed   : > { %638 = vmatmul.mubr.bf16.gmra.mrb[44].mxu0 %v2387_v39  ;;  %959 = vmatmul.mubr.bf16.gmra.mrb[44].mxu1 %v2388_v40 }
  0xee   : > { %647 = vmatprep.mubr.bf16.mxu0 %v2808_v0  ;;  %968 = vmatprep.mubr.bf16.mxu1 %v2808_v0 }
  0xf5   : > { %648 = vmatmul.mubr.bf16.gmra.mrb[48].mxu0 %v2389_v41  ;;  %969 = vmatmul.mubr.bf16.gmra.mrb[48].mxu1 %v2390_v42 }
  0xf6   : > { %657 = vmatprep.mubr.bf16.mxu0 %v2808_v0  ;;  %978 = vmatprep.mubr.bf16.mxu1 %v2808_v0 }
  0xfd   : > { %658 = vmatmul.mubr.bf16.gmra.mrb[52].mxu0 %v2391_v43  ;;  %979 = vmatmul.mubr.bf16.gmra.mrb[52].mxu1 %v2392_v44 }
  0xfe   : > { %667 = vmatprep.mubr.bf16.mxu0 %v2808_v0  ;;  %988 = vmatprep.mubr.bf16.mxu1 %v2808_v0 }
 0x105   : > { %668 = vmatmul.mubr.bf16.gmra.mrb[56].mxu0 %v2393_v45  ;;  %989 = vmatmul.mubr.bf16.gmra.mrb[56].mxu1 %v2394_v46 }
 0x106   : > { %677 = vmatprep.mubr.bf16.mxu0 %v2808_v0  ;;  %998 = vmatprep.mubr.bf16.mxu1 %v2808_v0 }
 0x10d   : > { %678 = vmatmul.mubr.bf16.gmra.mrb[60].mxu0 %v2395_v47  ;;  %999 = vmatmul.mubr.bf16.gmra.mrb[60].mxu1 %v2396_v48 }
 0x168   : > { %v529_v49 = vpop.f32.mrb[0].mxu0  ;;  %v850_v50 = vpop.f32.mrb[0].mxu1 }
 0x169   : > { %v1009_v51 = vmul.f32 %v529_v49, %v529_v49  ;;  %v1137_v52 = vmul.f32 %v850_v50, %v850_v50  ;;  %v531_v53 = vpop.f32.mrb[1].mxu0  ;;  %v852_v54 = vpop.f32.mrb[1].mxu1 }
 0x16a   : > { %v1041_v55 = vmul.f32 %v531_v53, %v531_v53  ;;  %v1169_v56 = vmul.f32 %v852_v54, %v852_v54  ;;  %v533_v57 = vpop.f32.mrb[2].mxu0  ;;  %v854_v58 = vpop.f32.mrb[2].mxu1 }
 0x16b   : > { %v1010_v59 = vmul.f32 %v533_v57, %v533_v57  ;;  %v1138_v60 = vmul.f32 %v854_v58, %v854_v58  ;;  %v535_v61 = vpop.f32.mrb[3].mxu0  ;;  %v856_v62 = vpop.f32.mrb[3].mxu1 }
 0x16c   : > { %v1073_v63 = vadd.f32 %v1041_v55, %v1009_v51  ;;  %v1201_v0 = vadd.f32 %v1169_v56, %v1137_v52  ;;  %v1042_v1 = vmul.f32 %v535_v61, %v535_v61  ;;  %v1170_v2 = vmul.f32 %v856_v62, %v856_v62 }
 0x16e   : > { %v3089_v3 = vmax.f32 %v1073_v63, 1e-07  ;;  %v3091_v4 = vmax.f32 %v1201_v0, 1e-07  ;;  %v1074_v5 = vadd.f32 %v1042_v1, %v1010_v59  ;;  %v1202_v6 = vadd.f32 %v1170_v2, %v1138_v60 }
 0x170   : > { %2397 = vrsqrt.f32 %v3089_v3  ;;  %v539_v7 = vpop.f32.mrb[4].mxu0  ;;  %v860_v8 = vpop.f32.mrb[4].mxu1  ;;  %v3095_v11 = vmax.f32 %v1074_v5, 1e-07  ;;  %v3097_v12 = vmax.f32 %v1202_v6, 1e-07 }
 0x171   : > { %2399 = vrsqrt.f32 %v3091_v4  ;;  %v541_v9 = vpop.f32.mrb[5].mxu0  ;;  %v862_v10 = vpop.f32.mrb[5].mxu1  ;;  %v1011_v13 = vmul.f32 %v539_v7, %v539_v7  ;;  %v1139_v14 = vmul.f32 %v860_v8, %v860_v8  ;;  %vm1267_vm0 = vcmp.eq.f32.partialorder %v3089_v3, inf }
 0x172   : > { %v543_v15 = vpop.f32.mrb[6].mxu0  ;;  %v864_v16 = vpop.f32.mrb[6].mxu1  ;;  %v1043_v17 = vmul.f32 %v541_v9, %v541_v9  ;;  %v1171_v18 = vmul.f32 %v862_v10, %v862_v10  ;;  %2401 = vrsqrt.f32 %v3095_v11  ;;  %v2010_v23 = vadd.f32 %v3097_v12, %v3091_v4 }
 0x173   : > { %v545_v19 = vpop.f32.mrb[7].mxu0  ;;  %v866_v20 = vpop.f32.mrb[7].mxu1  ;;  %v1012_v21 = vmul.f32 %v543_v15, %v543_v15  ;;  %2403 = vrsqrt.f32 %v3097_v12  ;;  %v1140_v22 = vmul.f32 %v864_v16, %v864_v16  ;;  %vm1269_vm1 = vcmp.eq.f32.partialorder %v3089_v3, 0.0 }
 0x174   : > { %v1075_v24 = vadd.f32 %v1043_v17, %v1011_v13  ;;  %v1203_v25 = vadd.f32 %v1171_v18, %v1139_v14  ;;  %v1044_v26 = vmul.f32 %v545_v19, %v545_v19  ;;  %v1270_v27 = vand.u32 2147483648, %v3089_v3 }
 0x175   : > { %v1172_v28 = vmul.f32 %v866_v20, %v866_v20  ;;  %vm1491_vm2 = vcmp.eq.f32.partialorder %v3091_v4, inf  ;;  %vm1493_vm3 = vcmp.eq.f32.partialorder %v3091_v4, 0.0  ;;  %v1494_v34 = vand.u32 2147483648, %v3091_v4 }
 0x176   : > { %v3106_v29 = vmax.f32 %v1075_v24, 1e-07  ;;  %v3108_v30 = vmax.f32 %v1203_v25, 1e-07  ;;  %v1076_v31 = vadd.f32 %v1044_v26, %v1012_v21  ;;  %vm1274_vm4 = vcmp.eq.f32.partialorder %v3095_v11, inf }
 0x177   : > { %v1204_v35 = vadd.f32 %v1172_v28, %v1140_v22  ;;  %vm1276_vm5 = vcmp.eq.f32.partialorder %v3095_v11, 0.0  ;;  %v1277_v39 = vand.u32 2147483648, %v3095_v11  ;;  %vm1498_vm6 = vcmp.eq.f32.partialorder %v3097_v12, inf }
 0x178   : > { %v549_v32 = vpop.f32.mrb[8].mxu0  ;;  %v870_v33 = vpop.f32.mrb[8].mxu1  ;;  %2405 = vrsqrt.f32 %v3106_v29  ;;  %vm1500_vm7 = vcmp.eq.f32.partialorder %v3097_v12, 0.0  ;;  %v1501_v47 = vand.u32 2147483648, %v3097_v12  ;;  %v2011_v48 = vadd.f32 %v2010_v23, %v3108_v30 }
 0x179   : > { %v551_v36 = vpop.f32.mrb[9].mxu0  ;;  %v872_v37 = vpop.f32.mrb[9].mxu1  ;;  %2407 = vrsqrt.f32 %v3108_v30  ;;  %v3132_v49 = vmax.f32 %v1076_v31, 1e-07  ;;  %v3137_v51 = vmax.f32 %v1204_v35, 1e-07  ;;  %v1013_v52 = vmul.f32 %v549_v32, %v549_v32 }
 0x17a   : > { %v2398_v38 = vpop.eup %2397  ;;  %v3117_v40 = vpop.f32.mrb[10].mxu0  ;;  %v1141_v53 = vmul.f32 %v870_v33, %v870_v33  ;;  %vm1281_vm8 = vcmp.eq.f32.partialorder %v3106_v29, inf  ;;  %v1284_v57 = vand.u32 2147483648, %v3106_v29  ;;  %vm1283_vm9 = vcmp.eq.f32.partialorder %v3106_v29, 0.0 }
 0x17b   : > { %v3119_v41 = vpop.f32.mrb[10].mxu1  ;;  %v2400_v42 = vpop.eup %2399  ;;  %v1266_v43 = vmul.f32 %v2398_v38, %v3089_v3  ;;  %2409 = vrsqrt.f32 %v3132_v49  ;;  %v1045_v61 = vmul.f32 %v551_v36, %v551_v36  ;;  %v1173_v0 = vmul.f32 %v872_v37, %v872_v37 }
 0x17c   : > { %v3125_v44 = vpop.f32.mrb[11].mxu0  ;;  %v3127_v45 = vpop.f32.mrb[11].mxu1  ;;  %v1490_v46 = vmul.f32 %v2400_v42, %v3091_v4  ;;  %vm1505_vm10 = vcmp.eq.f32.partialorder %v3108_v30, inf  ;;  %vm1507_vm11 = vcmp.eq.f32.partialorder %v3108_v30, 0.0  ;;  %v1508_v8 = vand.u32 2147483648, %v3108_v30 }
 0x17d   : > { %v1268_v50 = vsel %vm1267_vm0, %v3089_v3, %v1266_v43  ;;  %v2402_v54 = vpop.eup %2401  ;;  %vm1288_vm12 = vcmp.eq.f32.partialorder %v3132_v49, inf  ;;  %v2012_v14 = vadd.f32 %v2011_v48, %v3137_v51  ;;  %vm1290_vm13 = vcmp.eq.f32.partialorder %v3132_v49, 0.0 }
 0x17e   : > { %v1271_v55 = vsel %vm1269_vm1, %v1270_v27, %v1268_v50  ;;  %v1492_v56 = vsel %vm1491_vm2, %v3091_v4, %v1490_v46  ;;  %v2404_v58 = vpop.eup %2403  ;;  %v1273_v60 = vmul.f32 %v2402_v54, %v3095_v11  ;;  %v1205_v19 = vadd.f32 %v1173_v0, %v1141_v53 }
 0x17f   : > { %2411 = vlog2.f32 %v1271_v55  ;;  %v1495_v59 = vsel %vm1493_vm3, %v1494_v34, %v1492_v56  ;;  %v1497_v63 = vmul.f32 %v2404_v58, %v3097_v12  ;;  %v1291_v22 = vand.u32 2147483648, %v3132_v49 }
 0x180   : > { %v1713_v62 = vsub.f32 %v1495_v59, %v1271_v55  ;;  %2413 = vlog2.f32 %v1495_v59  ;;  %v3152_v1 = vpop.f32.mrb[12].mxu0  ;;  %v3154_v2 = vpop.f32.mrb[12].mxu1  ;;  %v1275_v3 = vsel %vm1274_vm4, %v3095_v11, %v1273_v60  ;;  %v1077_v11 = vadd.f32 %v1045_v61, %v1013_v52 }
 0x181   : > { %2415 = vrsqrt.f32 %v3137_v51  ;;  %v3162_v4 = vpop.f32.mrb[13].mxu0  ;;  %v3164_v5 = vpop.f32.mrb[13].mxu1  ;;  %v1278_v6 = vsel %vm1276_vm5, %v1277_v39, %v1275_v3  ;;  %v1499_v7 = vsel %vm1498_vm6, %v3097_v12, %v1497_v63  ;;  %vm1512_vm14 = vcmp.eq.f32.partialorder %v3137_v51, inf }
 0x182   : > { %v3173_v9 = vpop.f32.mrb[14].mxu0  ;;  %v3175_v10 = vpop.f32.mrb[14].mxu1  ;;  %2417 = vlog2.f32 %v1278_v6  ;;  %v1502_v13 = vsel %vm1500_vm7, %v1501_v47, %v1499_v7  ;;  %v3188_v12 = vmax.f32 %v1077_v11, 1e-07  ;;  %v1938_v23 = vmul.f32 %v1713_v62, %v1713_v62 }
 0x183   : > { %v3180_v15 = vpop.f32.mrb[15].mxu0  ;;  %v3182_v16 = vpop.f32.mrb[15].mxu1  ;;  %v1714_v18 = vsub.f32 %v1502_v13, %v1278_v6  ;;  %2419 = vlog2.f32 %v1502_v13  ;;  %v1014_v26 = vmul.f32 %v3117_v40, %v3117_v40  ;;  %v3197_v28 = vmax.f32 %v1205_v19, 1e-07 }
 0x184   : > { %v2406_v17 = vpop.eup %2405  ;;  %2421 = vrsqrt.f32 %v3188_v12  ;;  %v1142_v31 = vmul.f32 %v3119_v41, %v3119_v41  ;;  %v1046_v36 = vmul.f32 %v3125_v44, %v3125_v44  ;;  %vm1514_vm15 = vcmp.eq.f32.partialorder %v3137_v51, 0.0 }
 0x185   : > { %v2408_v20 = vpop.eup %2407  ;;  %v1280_v21 = vmul.f32 %v2406_v17, %v3106_v29  ;;  %v1939_v24 = vmul.f32 %v1714_v18, %v1714_v18  ;;  %v1515_v53 = vand.u32 2147483648, %v3137_v51  ;;  %v2013_v59 = vadd.f32 %v2012_v14, %v3197_v28 }
 0x186   : > { %v1504_v25 = vmul.f32 %v2408_v20, %v3108_v30  ;;  %v2410_v32 = vpop.eup %2409  ;;  %v1078_v62 = vadd.f32 %v1046_v36, %v1014_v26  ;;  %vm1295_vm0 = vcmp.eq.f32.partialorder %v3188_v12, inf  ;;  %vm1297_vm1 = vcmp.eq.f32.partialorder %v3188_v12, 0.0 }
 0x187   : > { %v1282_v27 = vsel %vm1281_vm8, %v3106_v29, %v1280_v21  ;;  %v1970_v33 = vadd.f32 %v1939_v24, %v1938_v23  ;;  %v1287_v41 = vmul.f32 %v2410_v32, %v3132_v49  ;;  %v1174_v29 = vmul.f32 %v3127_v45, %v3127_v45 }
 0x188   : > { %v1285_v34 = vsel %vm1283_vm9, %v1284_v57, %v1282_v27  ;;  %v1506_v35 = vsel %vm1505_vm10, %v3108_v30, %v1504_v25  ;;  %v3208_v37 = vpop.f32.mrb[16].mxu0  ;;  %v3210_v38 = vpop.f32.mrb[16].mxu1  ;;  %v3246_v13 = vmax.f32 %v1078_v62, 1e-07  ;;  %v1298_v11 = vand.u32 2147483648, %v3188_v12 }
 0x189   : > { %v2412_v39 = vpop.eup %2411  ;;  %2423 = vlog2.f32 %v1285_v34  ;;  %v1509_v40 = vsel %vm1507_vm11, %v1508_v8, %v1506_v35  ;;  %v3217_v42 = vpop.f32.mrb[17].mxu0  ;;  %v1289_v45 = vsel %vm1288_vm12, %v3132_v49, %v1287_v41  ;;  %v1206_v63 = vadd.f32 %v1174_v29, %v1142_v31 }
 0x18a   : > { %v3219_v43 = vpop.f32.mrb[17].mxu1  ;;  %v2414_v46 = vpop.eup %2413  ;;  %v1810_v44 = vmul.f32 0.6931472, %v2412_v39  ;;  %v1715_v47 = vsub.f32 %v1509_v40, %v1285_v34  ;;  %2425 = vlog2.f32 %v1509_v40  ;;  %v1292_v57 = vsel %vm1290_vm13, %v1291_v22, %v1289_v45 }
 0x18b   : > { %v3222_v48 = vpop.f32.mrb[18].mxu0  ;;  %v3224_v50 = vpop.f32.mrb[18].mxu1  ;;  %v1746_v52 = vmul.f32 0.6931472, %v2414_v46  ;;  %2427 = vrsqrt.f32 %v3197_v28  ;;  %v3249_v17 = vmax.f32 %v1206_v63, 1e-07  ;;  %v1015_v34 = vmul.f32 %v3152_v1, %v3152_v1 }
 0x18c   : > { %v2416_v30 = vpop.eup %2415  ;;  %v3231_v54 = vpop.f32.mrb[19].mxu0  ;;  %v1940_v56 = vmul.f32 %v1715_v47, %v1715_v47  ;;  %2429 = vlog2.f32 %v1292_v57  ;;  %vm1519_vm2 = vcmp.eq.f32.partialorder %v3197_v28, inf  ;;  %vm1521_vm3 = vcmp.eq.f32.partialorder %v3197_v28, 0.0 }
 0x18d   : > { %v3233_v55 = vpop.f32.mrb[19].mxu1  ;;  %v1511_v58 = vmul.f32 %v2416_v30, %v3137_v51  ;;  %v2418_v60 = vpop.eup %2417  ;;  %v1873_v61 = vsub.f32 %v1746_v52, %v1810_v44  ;;  %v1522_v25 = vand.u32 2147483648, %v3197_v28  ;;  %v1143_v35 = vmul.f32 %v3154_v2, %v3154_v2 }
 0x18e   : > { %v2420_v0 = vpop.eup %2419  ;;  %v1812_v3 = vmul.f32 0.6931472, %v2418_v60  ;;  %v1971_v6 = vadd.f32 %v1970_v33, %v1940_v56  ;;  %v2014_v46 = vadd.f32 %v2013_v59, %v3249_v17  ;;  %v1047_v2 = vmul.f32 %v3162_v4, %v3162_v4 }
 0x18f   : > { %v1513_v7 = vsel %vm1512_vm14, %v3137_v51, %v1511_v58  ;;  %v1748_v49 = vmul.f32 0.6931472, %v2420_v0  ;;  %v2422_v20 = vpop.eup %2421  ;;  %v1905_v32 = vand.u32 2147483647, %v1873_v61  ;;  %v1016_v56 = vmul.f32 %v3173_v9, %v3173_v9 }
 0x190   : > { %v1516_v8 = vsel %vm1514_vm15, %v1515_v53, %v1513_v7  ;;  %v3251_v18 = vpop.f32.mrb[20].mxu0  ;;  %v3253_v19 = vpop.f32.mrb[20].mxu1  ;;  %v1294_v24 = vmul.f32 %v2422_v20, %v3188_v12  ;;  %v1175_v53 = vmul.f32 %v3164_v5, %v3164_v5  ;;  %v1079_v59 = vadd.f32 %v1047_v2, %v1015_v34 }
 0x191   : > { %v1716_v14 = vsub.f32 %v1516_v8, %v1292_v57  ;;  %2431 = vlog2.f32 %v1516_v8  ;;  %v1874_v21 = vsub.f32 %v1748_v49, %v1812_v3  ;;  %v3258_v51 = vpop.f32.mrb[21].mxu0  ;;  %v3260_v22 = vpop.f32.mrb[21].mxu1  ;;  %v1144_v60 = vmul.f32 %v3175_v10, %v3175_v10 }
 0x192   : > { %2433 = vrsqrt.f32 %v3246_v13  ;;  %v3265_v26 = vpop.f32.mrb[22].mxu0  ;;  %v3267_v27 = vpop.f32.mrb[22].mxu1  ;;  %v1296_v29 = vsel %vm1295_vm0, %v3188_v12, %v1294_v24  ;;  %v1048_v12 = vmul.f32 %v3180_v15, %v3180_v15  ;;  %v1207_v62 = vadd.f32 %v1175_v53, %v1143_v35 }
 0x193   : > { %v1941_v23 = vmul.f32 %v1716_v14, %v1716_v14  ;;  %2435 = vrsqrt.f32 %v3249_v17  ;;  %v2424_v31 = vpop.eup %2423  ;;  %v1906_v33 = vand.u32 2147483647, %v1874_v21  ;;  %v3273_v36 = vpop.f32.mrb[23].mxu0  ;;  %v1299_v1 = vsel %vm1297_vm1, %v1298_v11, %v1296_v29 }
 0x194   : > { %v2426_v39 = vpop.eup %2425  ;;  %v1814_v40 = vmul.f32 0.6931472, %v2424_v31  ;;  %v3279_v44 = vpop.f32.mrb[23].mxu1  ;;  %2437 = vlog2.f32 %v1299_v1  ;;  %v1176_v5 = vmul.f32 %v3182_v16, %v3182_v16  ;;  %v3305_v3 = vmax.f32 %v1079_v59, 1e-07 }
 0x195   : > { %v1972_v41 = vadd.f32 %v1971_v6, %v1941_v23  ;;  %v2428_v47 = vpop.eup %2427  ;;  %v2050_v30 = vadd.f32 %v1906_v33, %v1905_v32  ;;  %v1750_v52 = vmul.f32 0.6931472, %v2426_v39  ;;  %v1080_v15 = vadd.f32 %v1048_v12, %v1016_v56 }
 0x196   : > { %v1518_v45 = vmul.f32 %v2428_v47, %v3197_v28  ;;  %v2430_v57 = vpop.eup %2429  ;;  %v3311_v14 = vmax.f32 %v1207_v62, 1e-07  ;;  %v1208_v16 = vadd.f32 %v1176_v5, %v1144_v60  ;;  %vm1302_vm4 = vcmp.eq.f32.partialorder %v3246_v13, inf }
 0x197   : > { %v1875_v58 = vsub.f32 %v1750_v52, %v1814_v40  ;;  %v1816_v61 = vmul.f32 0.6931472, %v2430_v57  ;;  %vm1304_vm5 = vcmp.eq.f32.partialorder %v3246_v13, 0.0  ;;  %v1305_v34 = vand.u32 2147483648, %v3246_v13 }
 0x198   : > { %v1520_v4 = vsel %vm1519_vm2, %v3197_v28, %v1518_v45  ;;  %v3299_v63 = vpop.f32.mrb[24].mxu0  ;;  %v3301_v9 = vpop.f32.mrb[24].mxu1  ;;  %vm1526_vm6 = vcmp.eq.f32.partialorder %v3249_v17, inf  ;;  %vm1528_vm7 = vcmp.eq.f32.partialorder %v3249_v17, 0.0  ;;  %v1529_v47 = vand.u32 2147483648, %v3249_v17 }
 0x199   : > { %v1907_v0 = vand.u32 2147483647, %v1875_v58  ;;  %v1523_v10 = vsel %vm1521_vm3, %v1522_v25, %v1520_v4  ;;  %v3307_v6 = vpop.f32.mrb[25].mxu0  ;;  %v3309_v7 = vpop.f32.mrb[25].mxu1  ;;  %v2015_v2 = vadd.f32 %v2014_v46, %v3311_v14  ;;  %v3334_v56 = vmax.f32 %v1080_v15, 1e-07 }
 0x19a   : > { %v1717_v8 = vsub.f32 %v1523_v10, %v1299_v1  ;;  %2439 = vlog2.f32 %v1523_v10  ;;  %v3313_v11 = vpop.f32.mrb[26].mxu0  ;;  %v3315_v20 = vpop.f32.mrb[26].mxu1  ;;  %v3336_v57 = vmax.f32 %v1208_v16, 1e-07  ;;  %vm1309_vm8 = vcmp.eq.f32.partialorder %v3305_v3, inf }
 0x19b   : > { %v2432_v49 = vpop.eup %2431  ;;  %v2051_v28 = vadd.f32 %v2050_v30, %v1907_v0  ;;  %2441 = vrsqrt.f32 %v3305_v3  ;;  %v3319_v24 = vpop.f32.mrb[27].mxu0  ;;  %vm1311_vm9 = vcmp.eq.f32.partialorder %v3305_v3, 0.0  ;;  %v1312_v46 = vand.u32 2147483648, %v3305_v3 }
 0x19c   : > { %v2434_v21 = vpop.eup %2433  ;;  %v1752_v23 = vmul.f32 0.6931472, %v2432_v49  ;;  %v3321_v25 = vpop.f32.mrb[27].mxu1  ;;  %v1942_v32 = vmul.f32 %v1717_v8, %v1717_v8  ;;  %2443 = vrsqrt.f32 %v3311_v14  ;;  %vm1533_vm10 = vcmp.eq.f32.partialorder %v3311_v14, inf }
 0x19d   : > { %v2436_v31 = vpop.eup %2435  ;;  %v1301_v33 = vmul.f32 %v2434_v21, %v3246_v13  ;;  %vm1535_vm11 = vcmp.eq.f32.partialorder %v3311_v14, 0.0  ;;  %v1536_v15 = vand.u32 2147483648, %v3311_v14  ;;  %v2016_v49 = vadd.f32 %v2015_v2, %v3336_v57 }
 0x19e   : > { %v1876_v35 = vsub.f32 %v1752_v23, %v1816_v61  ;;  %v1525_v39 = vmul.f32 %v2436_v31, %v3249_v17  ;;  %v1973_v40 = vadd.f32 %v1972_v41, %v1942_v32  ;;  %v2438_v45 = vpop.eup %2437  ;;  %v1017_v8 = vmul.f32 %v3208_v37, %v3208_v37 }
 0x19f   : > { %v1303_v29 = vsel %vm1302_vm4, %v3246_v13, %v1301_v33  ;;  %v1818_v4 = vmul.f32 0.6931472, %v2438_v45  ;;  %v1145_v16 = vmul.f32 %v3210_v38, %v3210_v38  ;;  %v1049_v31 = vmul.f32 %v3217_v42, %v3217_v42 }
 0x1a0   : > { %v1908_v30 = vand.u32 2147483647, %v1876_v35  ;;  %v1306_v52 = vsel %vm1304_vm5, %v1305_v34, %v1303_v29  ;;  %v1527_v1 = vsel %vm1526_vm6, %v3249_v17, %v1525_v39  ;;  %v3338_v41 = vpop.f32.mrb[28].mxu0  ;;  %v3340_v13 = vpop.f32.mrb[28].mxu1  ;;  %v1177_v32 = vmul.f32 %v3219_v43, %v3219_v43 }
 0x1a1   : > { %2445 = vlog2.f32 %v1306_v52  ;;  %v1530_v53 = vsel %vm1528_vm7, %v1529_v47, %v1527_v1  ;;  %v3343_v60 = vpop.f32.mrb[29].mxu0  ;;  %v3345_v17 = vpop.f32.mrb[29].mxu1  ;;  %v1018_v34 = vmul.f32 %v3222_v48, %v3222_v48  ;;  %v1146_v37 = vmul.f32 %v3224_v50, %v3224_v50 }
 0x1a2   : > { %v2052_v58 = vadd.f32 %v2051_v28, %v1908_v30  ;;  %v1718_v59 = vsub.f32 %v1530_v53, %v1306_v52  ;;  %2447 = vlog2.f32 %v1530_v53  ;;  %v3351_v12 = vpop.f32.mrb[30].mxu0  ;;  %v3353_v61 = vpop.f32.mrb[30].mxu1  ;;  %v1050_v38 = vmul.f32 %v3231_v54, %v3231_v54 }
 0x1a3   : > { %2449 = vrsqrt.f32 %v3334_v56  ;;  %v3357_v5 = vpop.f32.mrb[31].mxu0  ;;  %v3359_v0 = vpop.f32.mrb[31].mxu1  ;;  %v1209_v29 = vadd.f32 %v1177_v32, %v1145_v16  ;;  %v1178_v42 = vmul.f32 %v3233_v55, %v3233_v55  ;;  %vm1316_vm12 = vcmp.eq.f32.partialorder %v3334_v56, inf }
 0x1a4   : > { %v1943_v62 = vmul.f32 %v1718_v59, %v1718_v59  ;;  %2451 = vrsqrt.f32 %v3336_v57  ;;  %v2440_v10 = vpop.eup %2439  ;;  %v1082_v48 = vadd.f32 %v1050_v38, %v1018_v34  ;;  %vm1318_vm13 = vcmp.eq.f32.partialorder %v3334_v56, 0.0 }
 0x1a5   : > { %v2442_v21 = vpop.eup %2441  ;;  %v1754_v28 = vmul.f32 0.6931472, %v2440_v10  ;;  %v3393_v55 = vmax.f32 %v1209_v29, 1e-07  ;;  %v1210_v53 = vadd.f32 %v1178_v42, %v1146_v37  ;;  %v1319_v32 = vand.u32 2147483648, %v3334_v56 }
 0x1a6   : > { %v1974_v23 = vadd.f32 %v1973_v40, %v1943_v62  ;;  %v1308_v33 = vmul.f32 %v2442_v21, %v3305_v3  ;;  %v2444_v35 = vpop.eup %2443  ;;  %v1081_v40 = vadd.f32 %v1049_v31, %v1017_v8  ;;  %vm1540_vm14 = vcmp.eq.f32.partialorder %v3336_v57, inf }
 0x1a7   : > { %v1877_v39 = vsub.f32 %v1754_v28, %v1818_v4  ;;  %v1532_v47 = vmul.f32 %v2444_v35, %v3311_v14  ;;  %vm1542_vm15 = vcmp.eq.f32.partialorder %v3336_v57, 0.0  ;;  %v1543_v35 = vand.u32 2147483648, %v3336_v57 }
 0x1a8   : > { %v1310_v43 = vsel %vm1309_vm8, %v3305_v3, %v1308_v33  ;;  %v3385_v50 = vpop.f32.mrb[32].mxu0  ;;  %v3387_v30 = vpop.f32.mrb[32].mxu1  ;;  %v3391_v1 = vmax.f32 %v1081_v40, 1e-07  ;;  %v2017_v40 = vadd.f32 %v2016_v49, %v3393_v55  ;;  %v3425_v29 = vmax.f32 %v1082_v48, 1e-07 }
 0x1a9   : > { %v1909_v54 = vand.u32 2147483647, %v1877_v39  ;;  %v1313_v52 = vsel %vm1311_vm9, %v1312_v46, %v1310_v43  ;;  %v1534_v45 = vsel %vm1533_vm10, %v3311_v14, %v1532_v47  ;;  %v3399_v59 = vpop.f32.mrb[33].mxu0  ;;  %v3401_v4 = vpop.f32.mrb[33].mxu1  ;;  %v1019_v42 = vmul.f32 %v3251_v18, %v3251_v18 }
 0x1aa   : > { %2453 = vlog2.f32 %v1313_v52  ;;  %v1537_v10 = vsel %vm1535_vm11, %v1536_v15, %v1534_v45  ;;  %v3406_v8 = vpop.f32.mrb[34].mxu0  ;;  %v3408_v16 = vpop.f32.mrb[34].mxu1  ;;  %vm1323_vm0 = vcmp.eq.f32.partialorder %v3391_v1, inf  ;;  %vm1325_vm1 = vcmp.eq.f32.partialorder %v3391_v1, 0.0 }
 0x1ab   : > { %v2446_v2 = vpop.eup %2445  ;;  %v2053_v3 = vadd.f32 %v2052_v58, %v1909_v54  ;;  %2455 = vrsqrt.f32 %v3391_v1  ;;  %v1719_v31 = vsub.f32 %v1537_v10, %v1313_v52  ;;  %v3411_v33 = vpop.f32.mrb[35].mxu0  ;;  %vm1547_vm2 = vcmp.eq.f32.partialorder %v3393_v55, inf }
 0x1ac   : > { %v2448_v62 = vpop.eup %2447  ;;  %v1820_v46 = vmul.f32 0.6931472, %v2446_v2  ;;  %2457 = vlog2.f32 %v1537_v10  ;;  %v3413_v34 = vpop.f32.mrb[35].mxu1  ;;  %vm1549_vm3 = vcmp.eq.f32.partialorder %v3393_v55, 0.0  ;;  %vm1330_vm4 = vcmp.eq.f32.partialorder %v3425_v29, inf }
 0x1ad   : > { %v2450_v21 = vpop.eup %2449  ;;  %v1756_v28 = vmul.f32 0.6931472, %v2448_v62  ;;  %2459 = vrsqrt.f32 %v3393_v55  ;;  %v1944_v37 = vmul.f32 %v1719_v31, %v1719_v31  ;;  %v1326_v62 = vand.u32 2147483648, %v3391_v1 }
 0x1ae   : > { %v2452_v58 = vpop.eup %2451  ;;  %v1315_v14 = vmul.f32 %v2450_v21, %v3334_v56  ;;  %v1147_v21 = vmul.f32 %v3253_v19, %v3253_v19  ;;  %v1550_v19 = vand.u32 2147483648, %v3393_v55  ;;  %vm1332_vm5 = vcmp.eq.f32.partialorder %v3425_v29, 0.0 }
 0x1af   : > { %v1878_v15 = vsub.f32 %v1756_v28, %v1820_v46  ;;  %v1539_v38 = vmul.f32 %v2452_v58, %v3336_v57  ;;  %v1975_v47 = vadd.f32 %v1974_v23, %v1944_v37  ;;  %v1051_v28 = vmul.f32 %v3258_v51, %v3258_v51 }
 0x1b0   : > { %v1317_v39 = vsel %vm1316_vm12, %v3334_v56, %v1315_v14  ;;  %v3432_v2 = vpop.f32.mrb[36].mxu0  ;;  %v3434_v45 = vpop.f32.mrb[36].mxu1  ;;  %v1020_v51 = vmul.f32 %v3265_v26, %v3265_v26 }
 0x1b1   : > { %v1910_v43 = vand.u32 2147483647, %v1878_v15  ;;  %v1320_v54 = vsel %vm1318_vm13, %v1319_v32, %v1317_v39  ;;  %v1541_v52 = vsel %vm1540_vm14, %v3336_v57, %v1539_v38  ;;  %v3440_v18 = vpop.f32.mrb[37].mxu0  ;;  %v3442_v23 = vpop.f32.mrb[37].mxu1  ;;  %v3452_v57 = vmax.f32 %v1210_v53, 1e-07 }
 0x1b2   : > { %2461 = vlog2.f32 %v1320_v54  ;;  %v1544_v49 = vsel %vm1542_vm15, %v1543_v35, %v1541_v52  ;;  %v3447_v46 = vpop.f32.mrb[38].mxu0  ;;  %v3449_v10 = vpop.f32.mrb[38].mxu1  ;;  %v1179_v53 = vmul.f32 %v3260_v22, %v3260_v22  ;;  %v1083_v52 = vadd.f32 %v1051_v28, %v1019_v42 }
 0x1b3   : > { %v3444_v56 = vadd.f32 %v2053_v3, %v1910_v43  ;;  %v1720_v48 = vsub.f32 %v1544_v49, %v1320_v54  ;;  %2463 = vlog2.f32 %v1544_v49  ;;  %v3458_v3 = vpop.f32.mrb[39].mxu0  ;;  %v3460_v31 = vpop.f32.mrb[39].mxu1  ;;  %v2018_v39 = vadd.f32 %v2017_v40, %v3452_v57 }
 0x1b4   : > { %2465 = vrsqrt.f32 %v3425_v29  ;;  %v2454_v32 = vpop.eup %2453  ;;  %v1148_v43 = vmul.f32 %v3267_v27, %v3267_v27  ;;  %v1211_v49 = vadd.f32 %v1179_v53, %v1147_v21  ;;  %v1180_v40 = vmul.f32 %v3279_v44, %v3279_v44 }
 0x1b5   : > { %v1945_v58 = vmul.f32 %v1720_v48, %v1720_v48  ;;  %v2456_v14 = vpop.eup %2455  ;;  %v1822_v15 = vmul.f32 0.6931472, %v2454_v32  ;;  %2467 = vrsqrt.f32 %v3452_v57  ;;  %v1052_v48 = vmul.f32 %v3273_v36, %v3273_v36 }
 0x1b6   : > { %v2458_v37 = vpop.eup %2457  ;;  %v1322_v35 = vmul.f32 %v2456_v14, %v3391_v1  ;;  %v3489_v36 = vmax.f32 %v1083_v52, 1e-07  ;;  %v3491_v28 = vmax.f32 %v1211_v49, 1e-07  ;;  %vm1554_vm6 = vcmp.eq.f32.partialorder %v3452_v57, inf }
 0x1b7   : > { %v1976_v38 = vadd.f32 %v1975_v47, %v1945_v58  ;;  %v2460_v54 = vpop.eup %2459  ;;  %v1758_v22 = vmul.f32 0.6931472, %v2458_v37  ;;  %v1084_v14 = vadd.f32 %v1052_v48, %v1020_v51  ;;  %v1212_v37 = vadd.f32 %v1180_v40, %v1148_v43 }
 0x1b8   : > { %v1324_v26 = vsel %vm1323_vm0, %v3391_v1, %v1322_v35  ;;  %v1546_v47 = vmul.f32 %v2460_v54, %v3393_v55  ;;  %v3483_v32 = vpop.f32.mrb[40].mxu0  ;;  %v3485_v27 = vpop.f32.mrb[40].mxu1  ;;  %v1333_v48 = vand.u32 2147483648, %v3425_v29  ;;  %vm1556_vm7 = vcmp.eq.f32.partialorder %v3452_v57, 0.0 }
 0x1b9   : > { %v1879_v42 = vsub.f32 %v1758_v22, %v1822_v15  ;;  %v1327_v21 = vsel %vm1325_vm1, %v1326_v62, %v1324_v26  ;;  %v3493_v58 = vpop.f32.mrb[41].mxu0  ;;  %v3495_v53 = vpop.f32.mrb[41].mxu1  ;;  %vm1337_vm8 = vcmp.eq.f32.partialorder %v3489_v36, inf  ;;  %vm1339_vm9 = vcmp.eq.f32.partialorder %v3489_v36, 0.0 }
 0x1ba   : > { %2469 = vlog2.f32 %v1327_v21  ;;  %v1548_v44 = vsel %vm1547_vm2, %v3393_v55, %v1546_v47  ;;  %v3500_v35 = vpop.f32.mrb[42].mxu0  ;;  %v3502_v15 = vpop.f32.mrb[42].mxu1  ;;  %vm1561_vm10 = vcmp.eq.f32.partialorder %v3491_v28, inf  ;;  %vm1563_vm11 = vcmp.eq.f32.partialorder %v3491_v28, 0.0 }
 0x1bb   : > { %v1911_v62 = vand.u32 2147483647, %v1879_v42  ;;  %v1551_v54 = vsel %vm1549_vm3, %v1550_v19, %v1548_v44  ;;  %2471 = vrsqrt.f32 %v3489_v36  ;;  %v3508_v22 = vpop.f32.mrb[43].mxu0  ;;  %v3510_v52 = vpop.f32.mrb[43].mxu1  ;;  %v1557_v42 = vand.u32 2147483648, %v3452_v57 }
 0x1bc   : > { %v2462_v1 = vpop.eup %2461  ;;  %4303 = vst [vmem:[#allocation10_spill] sm:$0xff] %v3508_v22  ;;  %4304 = vst [vmem:[#allocation11_spill] sm:$0xff] %v3510_v52  ;;  %v1721_v43 = vsub.f32 %v1551_v54, %v1327_v21  ;;  %2473 = vlog2.f32 %v1551_v54  ;;  %v3520_v54 = vmax.f32 %v1084_v14, 1e-07 }
 0x1bd   : > { %v2464_v49 = vpop.eup %2463  ;;  %v1824_v51 = vmul.f32 0.6931472, %v2462_v1  ;;  %v2055_v47 = vadd.f32 %v3444_v56, %v1911_v62  ;;  %2475 = vrsqrt.f32 %v3491_v28  ;;  %v2019_v1 = vadd.f32 %v2018_v39, %v3491_v28 }
 0x1be   : > { %v2466_v26 = vpop.eup %2465  ;;  %v1760_v40 = vmul.f32 0.6931472, %v2464_v49  ;;  %v1946_v55 = vmul.f32 %v1721_v43, %v1721_v43  ;;  %v1021_v56 = vmul.f32 %v3299_v63, %v3299_v63  ;;  %2477 = vrsqrt.f32 %v3520_v54 }
 0x1bf   : > { %v1329_v19 = vmul.f32 %v2466_v26, %v3425_v29  ;;  %v2468_v44 = vpop.eup %2467  ;;  %v3528_v26 = vmax.f32 %v1212_v37, 1e-07  ;;  %v1340_v37 = vand.u32 2147483648, %v3489_v36  ;;  %vm1344_vm12 = vcmp.eq.f32.partialorder %v3520_v54, inf }
 0x1c0   : > { %v1880_v21 = vsub.f32 %v1760_v40, %v1824_v51  ;;  %v1977_v62 = vadd.f32 %v1976_v38, %v1946_v55  ;;  %v1553_v43 = vmul.f32 %v2468_v44, %v3452_v57  ;;  %v3530_v52 = vpop.f32.mrb[44].mxu0  ;;  %v3532_v22 = vpop.f32.mrb[44].mxu1  ;;  %vm1346_vm13 = vcmp.eq.f32.partialorder %v3520_v54, 0.0 }
 0x1c1   : > { %v1331_v49 = vsel %vm1330_vm4, %v3425_v29, %v1329_v19  ;;  %4305 = vst [vmem:[#allocation12_spill] sm:$0xff] %v3532_v22  ;;  %v3538_v63 = vpop.f32.mrb[45].mxu0  ;;  %v3540_v38 = vpop.f32.mrb[45].mxu1  ;;  %vm1568_vm14 = vcmp.eq.f32.partialorder %v3528_v26, inf  ;;  %vm1570_vm15 = vcmp.eq.f32.partialorder %v3528_v26, 0.0 }
 0x1c2   : > { %v1912_v51 = vand.u32 2147483647, %v1880_v21  ;;  %v1334_v39 = vsel %vm1332_vm5, %v1333_v48, %v1331_v49  ;;  %4306 = vst [vmem:[#allocation13_spill] sm:$0xff] %v3540_v38  ;;  %v1555_v14 = vsel %vm1554_vm6, %v3452_v57, %v1553_v43  ;;  %v3547_v40 = vpop.f32.mrb[46].mxu0  ;;  %v3549_v29 = vpop.f32.mrb[46].mxu1  ;;  %v1564_v43 = vand.u32 2147483648, %v3491_v28 }
 0x1c3   : > { %2479 = vlog2.f32 %v1334_v39  ;;  %4307 = vst [vmem:[#allocation14_spill] sm:$0xff] %v3547_v40  ;;  %4308 = vst [vmem:[#allocation15_spill] sm:$0xff] %v3549_v29  ;;  %v1558_v55 = vsel %vm1556_vm7, %v1557_v42, %v1555_v14  ;;  %v3555_v19 = vpop.f32.mrb[47].mxu0  ;;  %v3557_v44 = vpop.f32.mrb[47].mxu1  ;;  %v2020_v57 = vadd.f32 %v2019_v1, %v3528_v26  ;;  %v1149_v42 = vmul.f32 %v3301_v9, %v3301_v9 }
 0x1c4   : > { %v2056_v48 = vadd.f32 %v2055_v47, %v1912_v51  ;;  %2481 = vrsqrt.f32 %v3528_v26  ;;  %4309 = vst [vmem:[#allocation16_spill] sm:$0xff] %v3555_v19  ;;  %4310 = vst [vmem:[#allocation17_spill] sm:$0xff] %v3557_v44  ;;  %v2470_v21 = vpop.eup %2469  ;;  %v1722_v49 = vsub.f32 %v1558_v55, %v1334_v39  ;;  %v1053_v51 = vmul.f32 %v3307_v6, %v3307_v6 }
 0x1c5   : > { %2483 = vlog2.f32 %v1558_v55  ;;  %v2472_v29 = vpop.eup %2471  ;;  %v1826_v47 = vmul.f32 0.6931472, %v2470_v21  ;;  %v1181_v39 = vmul.f32 %v3309_v7, %v3309_v7  ;;  %v1022_v55 = vmul.f32 %v3313_v11, %v3313_v11 }
 0x1c6   : > { %v2474_v14 = vpop.eup %2473  ;;  %v1947_v19 = vmul.f32 %v1722_v49, %v1722_v49  ;;  %v1336_v44 = vmul.f32 %v2472_v29, %v3489_v36  ;;  %v1085_v1 = vadd.f32 %v1053_v51, %v1021_v56  ;;  %v1054_v9 = vmul.f32 %v3319_v24, %v3319_v24 }
 0x1c7   : > { %v2476_v40 = vpop.eup %2475  ;;  %v1762_v21 = vmul.f32 0.6931472, %v2474_v14  ;;  %v1213_v49 = vadd.f32 %v1181_v39, %v1149_v42  ;;  %v1347_v39 = vand.u32 2147483648, %v3520_v54 }
 0x1c8   : > { %v1978_v38 = vadd.f32 %v1977_v62, %v1947_v19  ;;  %v1338_v6 = vsel %vm1337_vm8, %v3489_v36, %v1336_v44  ;;  %v1560_v29 = vmul.f32 %v2476_v40, %v3491_v28  ;;  %v3578_v7 = vpop.f32.mrb[48].mxu0  ;;  %v3580_v22 = vpop.f32.mrb[48].mxu1  ;;  %v3584_v56 = vmax.f32 %v1085_v1, 1e-07 }
 0x1c9   : > { %v1881_v11 = vsub.f32 %v1762_v21, %v1826_v47  ;;  %v1341_v14 = vsel %vm1339_vm9, %v1340_v37, %v1338_v6  ;;  %v1086_v51 = vadd.f32 %v1054_v9, %v1022_v55  ;;  %v3586_v24 = vpop.f32.mrb[49].mxu0  ;;  %v3588_v62 = vpop.f32.mrb[49].mxu1  ;;  %v3594_v19 = vmax.f32 %v1213_v49, 1e-07 }
 0x1ca   : > { %2485 = vlog2.f32 %v1341_v14  ;;  %v1562_v40 = vsel %vm1561_vm10, %v3491_v28, %v1560_v29  ;;  %v3596_v44 = vpop.f32.mrb[50].mxu0  ;;  %v3598_v36 = vpop.f32.mrb[50].mxu1  ;;  %v1150_v29 = vmul.f32 %v3315_v20, %v3315_v20  ;;  %vm1351_vm0 = vcmp.eq.f32.partialorder %v3584_v56, inf }
 0x1cb   : > { %4311 = vst [vmem:[#allocation18_spill] sm:$0xff] %v3598_v36  ;;  %v2478_v37 = vpop.eup %2477  ;;  %v1913_v47 = vand.u32 2147483647, %v1881_v11  ;;  %v1565_v42 = vsel %vm1563_vm11, %v1564_v43, %v1562_v40  ;;  %2487 = vrsqrt.f32 %v3584_v56  ;;  %v3604_v55 = vpop.f32.mrb[51].mxu0  ;;  %v1182_v43 = vmul.f32 %v3321_v25, %v3321_v25 }
 0x1cc   : > { %4312 = vst [vmem:[#allocation19_spill] sm:$0xff] %v3604_v55  ;;  %v3606_v21 = vpop.f32.mrb[51].mxu1  ;;  %v1723_v9 = vsub.f32 %v1565_v42, %v1341_v14  ;;  %2489 = vlog2.f32 %v1565_v42  ;;  %v1343_v6 = vmul.f32 %v2478_v37, %v3520_v54  ;;  %vm1353_vm1 = vcmp.eq.f32.partialorder %v3584_v56, 0.0 }
 0x1cd   : > { %4313 = vst [vmem:[#allocation20_spill] sm:$0xff] %v3606_v21  ;;  %v2480_v1 = vpop.eup %2479  ;;  %v2057_v11 = vadd.f32 %v2056_v48, %v1913_v47  ;;  %2491 = vrsqrt.f32 %v3594_v19  ;;  %v1571_v48 = vand.u32 2147483648, %v3528_v26  ;;  %vm1575_vm2 = vcmp.eq.f32.partialorder %v3594_v19, inf }
 0x1ce   : > { %v2482_v49 = vpop.eup %2481  ;;  %v1828_v28 = vmul.f32 0.6931472, %v2480_v1  ;;  %v1948_v55 = vmul.f32 %v1723_v9, %v1723_v9  ;;  %v1345_v14 = vsel %vm1344_vm12, %v3520_v54, %v1343_v6  ;;  %v2021_v1 = vadd.f32 %v2020_v57, %v3594_v19 }
 0x1cf   : > { %v2484_v40 = vpop.eup %2483  ;;  %v1567_v42 = vmul.f32 %v2482_v49, %v3528_v26  ;;  %v1348_v20 = vsel %vm1346_vm13, %v1347_v39, %v1345_v14  ;;  %v1214_v54 = vadd.f32 %v1182_v43, %v1150_v29  ;;  %vm1577_vm3 = vcmp.eq.f32.partialorder %v3594_v19, 0.0 }
 0x1d0   : > { %v1764_v37 = vmul.f32 0.6931472, %v2484_v40  ;;  %v1979_v47 = vadd.f32 %v1978_v38, %v1948_v55  ;;  %2493 = vlog2.f32 %v1348_v20  ;;  %v3625_v9 = vpop.f32.mrb[52].mxu0  ;;  %v3627_v6 = vpop.f32.mrb[52].mxu1  ;;  %v3629_v40 = vmax.f32 %v1086_v51, 1e-07 }
 0x1d1   : > { %v1569_v25 = vsel %vm1568_vm14, %v3528_v26, %v1567_v42  ;;  %v3631_v39 = vpop.f32.mrb[53].mxu0  ;;  %v3633_v14 = vpop.f32.mrb[53].mxu1  ;;  %v1354_v55 = vand.u32 2147483648, %v3584_v56  ;;  %v1023_v51 = vmul.f32 %v3338_v41, %v3338_v41  ;;  %v3649_v42 = vmax.f32 %v1214_v54, 1e-07 }
 0x1d2   : > { %v1882_v49 = vsub.f32 %v1764_v37, %v1828_v28  ;;  %v1572_v21 = vsel %vm1570_vm15, %v1571_v48, %v1569_v25  ;;  %v3637_v26 = vpop.f32.mrb[54].mxu0  ;;  %v3639_v38 = vpop.f32.mrb[54].mxu1  ;;  %v1151_v37 = vmul.f32 %v3340_v13, %v3340_v13  ;;  %v1183_v41 = vmul.f32 %v3345_v17, %v3345_v17 }
 0x1d3   : > { %v1724_v36 = vsub.f32 %v1572_v21, %v1348_v20  ;;  %2495 = vlog2.f32 %v1572_v21  ;;  %4314 = vst [vmem:[#allocation21_spill] sm:$0xff] %v3637_v26  ;;  %4315 = vst [vmem:[#allocation22_spill] sm:$0xff] %v3639_v38  ;;  %v3645_v29 = vpop.f32.mrb[55].mxu0  ;;  %v3647_v28 = vpop.f32.mrb[55].mxu1  ;;  %v1055_v20 = vmul.f32 %v3343_v60, %v3343_v60  ;;  %v1578_v60 = vand.u32 2147483648, %v3594_v19 }
 0x1d4   : > { %v1914_v57 = vand.u32 2147483647, %v1882_v49  ;;  %2497 = vrsqrt.f32 %v3629_v40  ;;  %4316 = vst [vmem:[#allocation23_spill] sm:$0xff] %v3645_v29  ;;  %4317 = vst [vmem:[#allocation24_spill] sm:$0xff] %v3647_v28  ;;  %v2486_v21 = vpop.eup %2485  ;;  %vm1358_vm4 = vcmp.eq.f32.partialorder %v3629_v40, inf  ;;  %vm1360_vm5 = vcmp.eq.f32.partialorder %v3629_v40, 0.0 }
 0x1d5   : > { %v1949_v43 = vmul.f32 %v1724_v36, %v1724_v36  ;;  %v2488_v48 = vpop.eup %2487  ;;  %v1830_v49 = vmul.f32 0.6931472, %v2486_v21  ;;  %2499 = vrsqrt.f32 %v3649_v42  ;;  %v1087_v21 = vadd.f32 %v1055_v20, %v1023_v51 }
 0x1d6   : > { %v2058_v25 = vadd.f32 %v2057_v11, %v1914_v57  ;;  %v2490_v29 = vpop.eup %2489  ;;  %v1350_v36 = vmul.f32 %v2488_v48, %v3584_v56  ;;  %v2022_v11 = vadd.f32 %v2021_v1, %v3649_v42  ;;  %v1024_v57 = vmul.f32 %v3351_v12, %v3351_v12 }
 0x1d7   : > { %v1980_v28 = vadd.f32 %v1979_v47, %v1949_v43  ;;  %v2492_v13 = vpop.eup %2491  ;;  %v1766_v54 = vmul.f32 0.6931472, %v2490_v29  ;;  %v1215_v43 = vadd.f32 %v1183_v41, %v1151_v37  ;;  %v1056_v12 = vmul.f32 %v3357_v5, %v3357_v5 }
 0x1d8   : > { %v1352_v17 = vsel %vm1351_vm0, %v3584_v56, %v1350_v36  ;;  %v1574_v47 = vmul.f32 %v2492_v13, %v3594_v19  ;;  %v3669_v48 = vpop.f32.mrb[56].mxu0  ;;  %v3671_v38 = vpop.f32.mrb[56].mxu1  ;;  %v3685_v37 = vmax.f32 %v1087_v21, 1e-07  ;;  %v1361_v21 = vand.u32 2147483648, %v3629_v40 }
 0x1d9   : > { %v1883_v29 = vsub.f32 %v1766_v54, %v1830_v49  ;;  %v1355_v26 = vsel %vm1353_vm1, %v1354_v55, %v1352_v17  ;;  %v3678_v1 = vpop.f32.mrb[57].mxu0  ;;  %v3680_v36 = vpop.f32.mrb[57].mxu1  ;;  %v3687_v20 = vmax.f32 %v1215_v43, 1e-07  ;;  %v1088_v54 = vadd.f32 %v1056_v12, %v1024_v57 }
 0x1da   : > { %4318 = vst [vmem:[#allocation25_spill] sm:$0xff] %v3678_v1  ;;  %4319 = vst [vmem:[#allocation26_spill] sm:$0xff] %v3680_v36  ;;  %v2494_v13 = vpop.eup %2493  ;;  %2501 = vlog2.f32 %v1355_v26  ;;  %v1576_v51 = vsel %vm1575_vm2, %v3594_v19, %v1574_v47  ;;  %v3689_v56 = vpop.f32.mrb[58].mxu0  ;;  %vm1582_vm6 = vcmp.eq.f32.partialorder %v3649_v42, inf  ;;  %vm1584_vm7 = vcmp.eq.f32.partialorder %v3649_v42, 0.0 }
 0x1db   : > { %4320 = vst [vmem:[#allocation27_spill] sm:$0xff] %v3689_v56  ;;  %v3691_v55 = vpop.f32.mrb[58].mxu1  ;;  %v1915_v49 = vand.u32 2147483647, %v1883_v29  ;;  %v1832_v5 = vmul.f32 0.6931472, %v2494_v13  ;;  %v1579_v41 = vsel %vm1577_vm3, %v1578_v60, %v1576_v51  ;;  %v2023_v29 = vadd.f32 %v2022_v11, %v3687_v20 }
 0x1dc   : > { %4321 = vst [vmem:[#allocation28_spill] sm:$0xff] %v3691_v55  ;;  %v3695_v17 = vpop.f32.mrb[59].mxu0  ;;  %v3697_v36 = vpop.f32.mrb[59].mxu1  ;;  %v1725_v47 = vsub.f32 %v1579_v41, %v1355_v26  ;;  %2503 = vlog2.f32 %v1579_v41  ;;  %v1585_v57 = vand.u32 2147483648, %v3649_v42  ;;  %v3713_v51 = vmax.f32 %v1088_v54, 1e-07 }
 0x1dd   : > { %v2496_v1 = vpop.eup %2495  ;;  %v2059_v56 = vadd.f32 %v2058_v25, %v1915_v49  ;;  %2505 = vrsqrt.f32 %v3685_v37  ;;  %v1152_v25 = vmul.f32 %v3353_v61, %v3353_v61  ;;  %v1184_v49 = vmul.f32 %v3359_v0, %v3359_v0 }
 0x1de   : > { %v2498_v43 = vpop.eup %2497  ;;  %v1768_v55 = vmul.f32 0.6931472, %v2496_v1  ;;  %v1950_v19 = vmul.f32 %v1725_v47, %v1725_v47  ;;  %2507 = vrsqrt.f32 %v3687_v20  ;;  %vm1365_vm8 = vcmp.eq.f32.partialorder %v3685_v37, inf }
 0x1df   : > { %v1357_v60 = vmul.f32 %v2498_v43, %v3629_v40  ;;  %v2500_v12 = vpop.eup %2499  ;;  %vm1367_vm9 = vcmp.eq.f32.partialorder %v3685_v37, 0.0  ;;  %v1368_v0 = vand.u32 2147483648, %v3685_v37  ;;  %v1025_v54 = vmul.f32 %v3385_v50, %v3385_v50 }
 0x1e0   : > { %v1884_v26 = vsub.f32 %v1768_v55, %v1832_v5  ;;  %v1981_v1 = vadd.f32 %v1980_v28, %v1950_v19  ;;  %v3717_v41 = vpop.f32.mrb[60].mxu0  ;;  %v3719_v55 = vpop.f32.mrb[60].mxu1  ;;  %v1581_v61 = vmul.f32 %v2500_v12, %v3649_v42  ;;  %vm1589_vm10 = vcmp.eq.f32.partialorder %v3687_v20, inf }
 0x1e1   : > { %v1359_v13 = vsel %vm1358_vm4, %v3629_v40, %v1357_v60  ;;  %v3725_v28 = vpop.f32.mrb[61].mxu0  ;;  %v3727_v47 = vpop.f32.mrb[61].mxu1  ;;  %v1216_v60 = vadd.f32 %v1184_v49, %v1152_v25  ;;  %vm1591_vm11 = vcmp.eq.f32.partialorder %v3687_v20, 0.0  ;;  %vm1372_vm12 = vcmp.eq.f32.partialorder %v3713_v51, inf }
 0x1e2   : > { %v1916_v5 = vand.u32 2147483647, %v1884_v26  ;;  %v1362_v11 = vsel %vm1360_vm5, %v1361_v21, %v1359_v13  ;;  %v3733_v43 = vpop.f32.mrb[62].mxu0  ;;  %v3735_v40 = vpop.f32.mrb[62].mxu1  ;;  %v1583_v19 = vsel %vm1582_vm6, %v3649_v42, %v1581_v61  ;;  %vm1374_vm13 = vcmp.eq.f32.partialorder %v3713_v51, 0.0 }
 0x1e3   : > { %2509 = vlog2.f32 %v1362_v11  ;;  %4322 = vst [vmem:[#allocation29_spill] sm:$0xff] %v3733_v43  ;;  %4323 = vst [vmem:[#allocation30_spill] sm:$0xff] %v3735_v40  ;;  %v3741_v26 = vpop.f32.mrb[63].mxu0  ;;  %v3743_v12 = vpop.f32.mrb[63].mxu1  ;;  %v1586_v50 = vsel %vm1584_vm7, %v1585_v57, %v1583_v19  ;;  %v1153_v43 = vmul.f32 %v3387_v30, %v3387_v30  ;;  %v3753_v25 = vmax.f32 %v1216_v60, 1e-07 }
 0x1e4   : > { %v2060_v21 = vadd.f32 %v2059_v56, %v1916_v5  ;;  %2511 = vrsqrt.f32 %v3713_v51  ;;  %4324 = vst [vmem:[#allocation31_spill] sm:$0xff] %v3743_v12  ;;  %v2502_v13 = vpop.eup %2501  ;;  %v1057_v56 = vmul.f32 %v3399_v59, %v3399_v59  ;;  %v1185_v5 = vmul.f32 %v3401_v4, %v3401_v4 }
 0x1e5   : > { %v1834_v61 = vmul.f32 0.6931472, %v2502_v13  ;;  %v1726_v40 = vsub.f32 %v1586_v50, %v1362_v11  ;;  %2513 = vlog2.f32 %v1586_v50  ;;  %v1592_v59 = vand.u32 2147483648, %v3687_v20 }
 0x1e6   : > { %v2504_v49 = vpop.eup %2503  ;;  %v1089_v42 = vadd.f32 %v1057_v56, %v1025_v54  ;;  %v1217_v57 = vadd.f32 %v1185_v5, %v1153_v43  ;;  %2515 = vrsqrt.f32 %v3753_v25  ;;  %v2024_v60 = vadd.f32 %v2023_v29, %v3753_v25 }
 0x1e7   : > { %v2506_v19 = vpop.eup %2505  ;;  %v1770_v30 = vmul.f32 0.6931472, %v2504_v49  ;;  %v1951_v12 = vmul.f32 %v1726_v40, %v1726_v40  ;;  %v1026_v5 = vmul.f32 %v3406_v8, %v3406_v8  ;;  %v1154_v49 = vmul.f32 %v3408_v16, %v3408_v16 }
 0x1e8   : > { %v2508_v4 = vpop.eup %2507  ;;  %v1364_v11 = vmul.f32 %v2506_v19, %v3685_v37  ;;  %v3764_v43 = vmax.f32 %v1089_v42, 1e-07  ;;  %v3769_v56 = vmax.f32 %v1217_v57, 1e-07  ;;  %v1058_v8 = vmul.f32 %v3411_v33, %v3411_v33 }
 0x1e9   : > { %v1885_v13 = vsub.f32 %v1770_v30, %v1834_v61  ;;  %v1982_v50 = vadd.f32 %v1981_v1, %v1951_v12  ;;  %v1588_v54 = vmul.f32 %v2508_v4, %v3687_v20  ;;  %v1186_v16 = vmul.f32 %v3413_v34, %v3413_v34 }
 0x1ea   : > { %v1366_v40 = vsel %vm1365_vm8, %v3685_v37, %v1364_v11  ;;  %2517 = vrsqrt.f32 %v3764_v43  ;;  %v1375_v57 = vand.u32 2147483648, %v3713_v51  ;;  %vm1596_vm14 = vcmp.eq.f32.partialorder %v3753_v25, inf }
 0x1eb   : > { %v1917_v19 = vand.u32 2147483647, %v1885_v13  ;;  %v1369_v29 = vsel %vm1367_vm9, %v1368_v0, %v1366_v40  ;;  %v1590_v1 = vsel %vm1589_vm10, %v3687_v20, %v1588_v54  ;;  %vm1598_vm15 = vcmp.eq.f32.partialorder %v3753_v25, 0.0 }
 0x1ec   : > { %2519 = vlog2.f32 %v1369_v29  ;;  %v1593_v61 = vsel %vm1591_vm11, %v1592_v59, %v1590_v1  ;;  %v1599_v33 = vand.u32 2147483648, %v3753_v25  ;;  %v2025_v34 = vadd.f32 %v2024_v60, %v3769_v56 }
 0x1ed   : > { %v2510_v12 = vpop.eup %2509  ;;  %v2061_v37 = vadd.f32 %v2060_v21, %v1917_v19  ;;  %v1727_v0 = vsub.f32 %v1593_v61, %v1369_v29  ;;  %2521 = vlog2.f32 %v1593_v61  ;;  %v1090_v13 = vadd.f32 %v1058_v8, %v1026_v5 }
 0x1ee   : > { %v2512_v42 = vpop.eup %2511  ;;  %v1836_v30 = vmul.f32 0.6931472, %v2510_v12  ;;  %2523 = vrsqrt.f32 %v3769_v56  ;;  %v1218_v54 = vadd.f32 %v1186_v16, %v1154_v49  ;;  %vm1379_vm0 = vcmp.eq.f32.partialorder %v3764_v43, inf }
 0x1ef   : > { %v1371_v4 = vmul.f32 %v2512_v42, %v3713_v51  ;;  %v2514_v20 = vpop.eup %2513  ;;  %v1952_v59 = vmul.f32 %v1727_v0, %v1727_v0  ;;  %vm1381_vm1 = vcmp.eq.f32.partialorder %v3764_v43, 0.0  ;;  %v3802_v12 = vmax.f32 %v1090_v13, 1e-07 }
 0x1f0   : > { %v1772_v21 = vmul.f32 0.6931472, %v2514_v20  ;;  %v2516_v40 = vpop.eup %2515  ;;  %v1382_v61 = vand.u32 2147483648, %v3764_v43  ;;  %vm1603_vm2 = vcmp.eq.f32.partialorder %v3769_v56, inf  ;;  %v3806_v5 = vmax.f32 %v1218_v54, 1e-07 }
 0x1f1   : > { %v1373_v11 = vsel %vm1372_vm12, %v3713_v51, %v1371_v4  ;;  %v1983_v19 = vadd.f32 %v1982_v50, %v1952_v59  ;;  %v1595_v60 = vmul.f32 %v2516_v40, %v3753_v25  ;;  %v1027_v51 = vmul.f32 %v3432_v2, %v3432_v2 }
 0x1f2   : > { %v1376_v29 = vsel %vm1374_vm13, %v1375_v57, %v1373_v11  ;;  %v1886_v1 = vsub.f32 %v1772_v21, %v1836_v30  ;;  %v1155_v8 = vmul.f32 %v3434_v45, %v3434_v45  ;;  %v1059_v0 = vmul.f32 %v3440_v18, %v3440_v18 }
 0x1f3   : > { %2525 = vlog2.f32 %v1376_v29  ;;  %v1597_v49 = vsel %vm1596_vm14, %v3753_v25, %v1595_v60  ;;  %v1187_v2 = vmul.f32 %v3442_v23, %v3442_v23  ;;  %vm1605_vm3 = vcmp.eq.f32.partialorder %v3769_v56, 0.0 }
 0x1f4   : > { %v1918_v50 = vand.u32 2147483647, %v1886_v1  ;;  %2527 = vrsqrt.f32 %v3802_v12  ;;  %v2518_v16 = vpop.eup %2517  ;;  %v1600_v42 = vsel %vm1598_vm15, %v1599_v33, %v1597_v49  ;;  %v1606_v25 = vand.u32 2147483648, %v3769_v56 }
 0x1f5   : > { %2529 = vrsqrt.f32 %v3806_v5  ;;  %v1728_v4 = vsub.f32 %v1600_v42, %v1376_v29  ;;  %v1378_v20 = vmul.f32 %v2518_v16, %v3764_v43  ;;  %v1028_v33 = vmul.f32 %v3447_v46, %v3447_v46 }
 0x1f6   : > { %v2520_v57 = vpop.eup %2519  ;;  %v2062_v30 = vadd.f32 %v2061_v37, %v1918_v50  ;;  %2531 = vlog2.f32 %v1600_v42  ;;  %v2026_v37 = vadd.f32 %v2025_v34, %v3806_v5  ;;  %v1091_v40 = vadd.f32 %v1059_v0, %v1027_v51 }
 0x1f7   : > { %v2522_v59 = vpop.eup %2521  ;;  %v1838_v45 = vmul.f32 0.6931472, %v2520_v57  ;;  %v1953_v11 = vmul.f32 %v1728_v4, %v1728_v4  ;;  %v1380_v23 = vsel %vm1379_vm0, %v3764_v43, %v1378_v20  ;;  %v1219_v29 = vadd.f32 %v1187_v2, %v1155_v8 }
 0x1f8   : > { %v2524_v21 = vpop.eup %2523  ;;  %v1774_v18 = vmul.f32 0.6931472, %v2522_v59  ;;  %v1383_v13 = vsel %vm1381_vm1, %v1382_v61, %v1380_v23  ;;  %vm1386_vm4 = vcmp.eq.f32.partialorder %v3802_v12, inf  ;;  %vm1388_vm5 = vcmp.eq.f32.partialorder %v3802_v12, 0.0 }
 0x1f9   : > { %v1602_v54 = vmul.f32 %v2524_v21, %v3769_v56  ;;  %v1984_v60 = vadd.f32 %v1983_v19, %v1953_v11  ;;  %2533 = vlog2.f32 %v1383_v13  ;;  %v3840_v50 = vmax.f32 %v1091_v40, 1e-07 }
 0x1fa   : > { %v1887_v1 = vsub.f32 %v1774_v18, %v1838_v45  ;;  %v3842_v34 = vmax.f32 %v1219_v29, 1e-07  ;;  %v1389_v19 = vand.u32 2147483648, %v3802_v12  ;;  %vm1610_vm6 = vcmp.eq.f32.partialorder %v3806_v5, inf }
 0x1fb   : > { %v1604_v46 = vsel %vm1603_vm2, %v3769_v56, %v1602_v54  ;;  %vm1612_vm7 = vcmp.eq.f32.partialorder %v3806_v5, 0.0  ;;  %v1060_v8 = vmul.f32 %v3458_v3, %v3458_v3  ;;  %v1156_v0 = vmul.f32 %v3449_v10, %v3449_v10 }
 0x1fc   : > { %v1919_v61 = vand.u32 2147483647, %v1887_v1  ;;  %v1607_v51 = vsel %vm1605_vm3, %v1606_v25, %v1604_v46  ;;  %v1188_v56 = vmul.f32 %v3460_v31, %v3460_v31  ;;  %v2027_v45 = vadd.f32 %v2026_v37, %v3842_v34 }
 0x1fd   : > { %v2526_v43 = vpop.eup %2525  ;;  %v1729_v49 = vsub.f32 %v1607_v51, %v1383_v13  ;;  %2535 = vlog2.f32 %v1607_v51  ;;  %v1029_v10 = vmul.f32 %v3483_v32, %v3483_v32  ;;  %v1092_v18 = vadd.f32 %v1060_v8, %v1028_v33 }
 0x1fe   : > { %v2528_v16 = vpop.eup %2527  ;;  %v2063_v42 = vadd.f32 %v2062_v30, %v1919_v61  ;;  %2537 = vrsqrt.f32 %v3840_v50  ;;  %v1840_v57 = vmul.f32 0.6931472, %v2526_v43  ;;  %v1613_v30 = vand.u32 2147483648, %v3806_v5 }
 0x1ff   : > { %v2530_v2 = vpop.eup %2529  ;;  %v1954_v4 = vmul.f32 %v1729_v49, %v1729_v49  ;;  %v1385_v20 = vmul.f32 %v2528_v16, %v3802_v12  ;;  %2539 = vrsqrt.f32 %v3842_v34  ;;  %vm1393_vm8 = vcmp.eq.f32.partialorder %v3840_v50, inf }
 0x200   : > { %v2532_v59 = vpop.eup %2531  ;;  %v1609_v3 = vmul.f32 %v2530_v2, %v3806_v5  ;;  %v1220_v37 = vadd.f32 %v1188_v56, %v1156_v0  ;;  %v3874_v54 = vmax.f32 %v1092_v18, 1e-07  ;;  %vm1395_vm9 = vcmp.eq.f32.partialorder %v3840_v50, 0.0 }
 0x201   : > { %v1776_v25 = vmul.f32 0.6931472, %v2532_v59  ;;  %v1985_v21 = vadd.f32 %v1984_v60, %v1954_v4  ;;  %v1387_v31 = vsel %vm1386_vm4, %v3802_v12, %v1385_v20  ;;  %v1061_v12 = vmul.f32 %v3493_v58, %v3493_v58 }
 0x202   : > { %v1390_v11 = vsel %vm1388_vm5, %v1389_v19, %v1387_v31  ;;  %v1611_v23 = vsel %vm1610_vm6, %v3806_v5, %v1609_v3  ;;  %v3876_v33 = vmax.f32 %v1220_v37, 1e-07  ;;  %v1396_v60 = vand.u32 2147483648, %v3840_v50 }
 0x203   : > { %v1888_v13 = vsub.f32 %v1776_v25, %v1840_v57  ;;  %2541 = vlog2.f32 %v1390_v11  ;;  %v1614_v32 = vsel %vm1612_vm7, %v1613_v30, %v1611_v23  ;;  %v2534_v40 = vpop.eup %2533  ;;  %vm1617_vm10 = vcmp.eq.f32.partialorder %v3842_v34, inf }
 0x204   : > { %v1730_v29 = vsub.f32 %v1614_v32, %v1390_v11  ;;  %2543 = vlog2.f32 %v1614_v32  ;;  %v1842_v46 = vmul.f32 0.6931472, %v2534_v40  ;;  %vm1619_vm11 = vcmp.eq.f32.partialorder %v3842_v34, 0.0 }
 0x205   : > { %v1920_v1 = vand.u32 2147483647, %v1888_v13  ;;  %2545 = vrsqrt.f32 %v3874_v54  ;;  %v1620_v51 = vand.u32 2147483648, %v3842_v34  ;;  %v1157_v58 = vmul.f32 %v3485_v27, %v3485_v27 }
 0x206   : > { %v1955_v5 = vmul.f32 %v1730_v29, %v1730_v29  ;;  %2547 = vrsqrt.f32 %v3876_v33  ;;  %v2028_v16 = vadd.f32 %v2027_v45, %v3876_v33  ;;  %v1093_v0 = vadd.f32 %v1061_v12, %v1029_v10  ;;  %v4325_v45 = vld [vmem:[#allocation10_spill] sm:$0xff] }
 0x207   : > { %v2536_v43 = vpop.eup %2535  ;;  %v2064_v61 = vadd.f32 %v2063_v42, %v1920_v1  ;;  %vm1400_vm12 = vcmp.eq.f32.partialorder %v3874_v54, inf  ;;  %v1189_v42 = vmul.f32 %v3495_v53, %v3495_v53  ;;  %v1030_v57 = vmul.f32 %v3500_v35, %v3500_v35  ;;  %v4326_v53 = vld [vmem:[#allocation11_spill] sm:$0xff] }
 0x208   : > { %v2538_v19 = vpop.eup %2537  ;;  %v1778_v49 = vmul.f32 0.6931472, %v2536_v43  ;;  %v1986_v8 = vadd.f32 %v1985_v21, %v1955_v5  ;;  %v3897_v20 = vmax.f32 %v1093_v0, 1e-07  ;;  %v1158_v59 = vmul.f32 %v3502_v15, %v3502_v15 }
 0x209   : > { %v2540_v56 = vpop.eup %2539  ;;  %v1392_v2 = vmul.f32 %v2538_v19, %v3840_v50  ;;  %v1221_v30 = vadd.f32 %v1189_v42, %v1157_v58  ;;  %v1062_v10 = vmul.f32 %v4325_v45, %v4325_v45  ;;  %v1190_v25 = vmul.f32 %v4326_v53, %v4326_v53 }
 0x20a   : > { %v1889_v4 = vsub.f32 %v1778_v49, %v1842_v46  ;;  %v1616_v27 = vmul.f32 %v2540_v56, %v3842_v34  ;;  %2549 = vrsqrt.f32 %v3897_v20  ;;  %vm1402_vm13 = vcmp.eq.f32.partialorder %v3874_v54, 0.0 }
 0x20b   : > { %v1394_v3 = vsel %vm1393_vm8, %v3840_v50, %v1392_v2  ;;  %v1403_v11 = vand.u32 2147483648, %v3874_v54  ;;  %vm1624_vm14 = vcmp.eq.f32.partialorder %v3876_v33, inf  ;;  %v3919_v29 = vmax.f32 %v1221_v30, 1e-07 }
 0x20c   : > { %v1921_v35 = vand.u32 2147483647, %v1889_v4  ;;  %v1397_v21 = vsel %vm1395_vm9, %v1396_v60, %v1394_v3  ;;  %v1618_v31 = vsel %vm1617_vm10, %v3842_v34, %v1616_v27  ;;  %v1094_v12 = vadd.f32 %v1062_v10, %v1030_v57 }
 0x20d   : > { %v2542_v15 = vpop.eup %2541  ;;  %2551 = vlog2.f32 %v1397_v21  ;;  %v1621_v18 = vsel %vm1619_vm11, %v1620_v51, %v1618_v31  ;;  %vm1626_vm15 = vcmp.eq.f32.partialorder %v3876_v33, 0.0  ;;  %v1222_v46 = vadd.f32 %v1190_v25, %v1158_v59 }
 0x20e   : > { %v2544_v23 = vpop.eup %2543  ;;  %v2065_v37 = vadd.f32 %v2064_v61, %v1921_v35  ;;  %v1844_v13 = vmul.f32 0.6931472, %v2542_v15  ;;  %v1731_v50 = vsub.f32 %v1621_v18, %v1397_v21  ;;  %2553 = vlog2.f32 %v1621_v18 }
 0x20f   : > { %v2546_v32 = vpop.eup %2545  ;;  %v1780_v40 = vmul.f32 0.6931472, %v2544_v23  ;;  %v1627_v61 = vand.u32 2147483648, %v3876_v33  ;;  %2555 = vrsqrt.f32 %v3919_v29  ;;  %vm1407_vm0 = vcmp.eq.f32.partialorder %v3897_v20, inf }
 0x210   : > { %v2548_v1 = vpop.eup %2547  ;;  %v1956_v60 = vmul.f32 %v1731_v50, %v1731_v50  ;;  %v1399_v34 = vmul.f32 %v2546_v32, %v3874_v54  ;;  %v1031_v19 = vmul.f32 %v3530_v52, %v3530_v52  ;;  %v2029_v2 = vadd.f32 %v2028_v16, %v3919_v29  ;;  %v4330_v50 = vld [vmem:[#allocation15_spill] sm:$0xff] }
 0x211   : > { %v1890_v5 = vsub.f32 %v1780_v40, %v1844_v13  ;;  %v1623_v43 = vmul.f32 %v2548_v1, %v3876_v33  ;;  %v3938_v42 = vmax.f32 %v1094_v12, 1e-07  ;;  %v3940_v57 = vmax.f32 %v1222_v46, 1e-07 }
 0x212   : > { %v1987_v51 = vadd.f32 %v1986_v8, %v1956_v60  ;;  %v1401_v58 = vsel %vm1400_vm12, %v3874_v54, %v1399_v34  ;;  %v1063_v52 = vmul.f32 %v3538_v63, %v3538_v63  ;;  %vm1409_vm1 = vcmp.eq.f32.partialorder %v3897_v20, 0.0  ;;  %v4331_v60 = vld [vmem:[#allocation16_spill] sm:$0xff] }
 0x213   : > { %v1922_v49 = vand.u32 2147483647, %v1890_v5  ;;  %v1404_v0 = vsel %vm1402_vm13, %v1403_v11, %v1401_v58  ;;  %v1625_v56 = vsel %vm1624_vm14, %v3876_v33, %v1623_v43  ;;  %v1410_v59 = vand.u32 2147483648, %v3897_v20  ;;  %v4327_v33 = vld [vmem:[#allocation12_spill] sm:$0xff]  ;;  %v4328_v11 = vld [vmem:[#allocation13_spill] sm:$0xff] }
 0x214   : > { %2557 = vlog2.f32 %v1404_v0  ;;  %v1628_v8 = vsel %vm1626_vm15, %v1627_v61, %v1625_v56  ;;  %v2550_v54 = vpop.eup %2549  ;;  %v1159_v16 = vmul.f32 %v4327_v33, %v4327_v33  ;;  %vm1631_vm2 = vcmp.eq.f32.partialorder %v3919_v29, inf  ;;  %v4332_v5 = vld [vmem:[#allocation17_spill] sm:$0xff] }
 0x215   : > { %v2066_v4 = vadd.f32 %v2065_v37, %v1922_v49  ;;  %v1732_v27 = vsub.f32 %v1628_v8, %v1404_v0  ;;  %2559 = vlog2.f32 %v1628_v8  ;;  %v1406_v45 = vmul.f32 %v2550_v54, %v3897_v20  ;;  %v4329_v37 = vld [vmem:[#allocation14_spill] sm:$0xff] }
 0x216   : > { %2561 = vrsqrt.f32 %v3938_v42  ;;  %vm1633_vm3 = vcmp.eq.f32.partialorder %v3919_v29, 0.0  ;;  %v1634_v53 = vand.u32 2147483648, %v3919_v29  ;;  %v2030_v25 = vadd.f32 %v2029_v2, %v3940_v57 }
 0x217   : > { %v2552_v3 = vpop.eup %2551  ;;  %v1957_v30 = vmul.f32 %v1732_v27, %v1732_v27  ;;  %2563 = vrsqrt.f32 %v3940_v57  ;;  %v1408_v31 = vsel %vm1407_vm0, %v3897_v20, %v1406_v45  ;;  %v1095_v15 = vadd.f32 %v1063_v52, %v1031_v19 }
 0x218   : > { %v2554_v10 = vpop.eup %2553  ;;  %v1846_v63 = vmul.f32 0.6931472, %v2552_v3  ;;  %v1411_v18 = vsel %vm1409_vm1, %v1410_v59, %v1408_v31  ;;  %v1191_v23 = vmul.f32 %v4328_v11, %v4328_v11  ;;  %v1032_v13 = vmul.f32 %v4329_v37, %v4329_v37 }
 0x219   : > { %v1782_v35 = vmul.f32 0.6931472, %v2554_v10  ;;  %v1988_v21 = vadd.f32 %v1987_v51, %v1957_v30  ;;  %v1160_v32 = vmul.f32 %v4330_v50, %v4330_v50  ;;  %v2556_v40 = vpop.eup %2555  ;;  %2565 = vlog2.f32 %v1411_v18 }
 0x21a   : > { %v3966_v1 = vmax.f32 %v1095_v15, 1e-07  ;;  %v1064_v34 = vmul.f32 %v4331_v60, %v4331_v60  ;;  %v1630_v20 = vmul.f32 %v2556_v40, %v3919_v29  ;;  %vm1414_vm4 = vcmp.eq.f32.partialorder %v3938_v42, inf }
 0x21b   : > { %v1891_v12 = vsub.f32 %v1782_v35, %v1846_v63  ;;  %v1223_v46 = vadd.f32 %v1191_v23, %v1159_v16  ;;  %v1192_v43 = vmul.f32 %v4332_v5, %v4332_v5  ;;  %vm1416_vm5 = vcmp.eq.f32.partialorder %v3938_v42, 0.0 }
 0x21c   : > { %v1417_v51 = vand.u32 2147483648, %v3938_v42  ;;  %2567 = vrsqrt.f32 %v3966_v1  ;;  %v1632_v19 = vsel %vm1631_vm2, %v3919_v29, %v1630_v20  ;;  %vm1638_vm6 = vcmp.eq.f32.partialorder %v3940_v57, inf }
 0x21d   : > { %v1923_v61 = vand.u32 2147483647, %v1891_v12  ;;  %v3981_v49 = vmax.f32 %v1223_v46, 1e-07  ;;  %v1096_v0 = vadd.f32 %v1064_v34, %v1032_v13  ;;  %v1635_v27 = vsel %vm1633_vm3, %v1634_v53, %v1632_v19 }
 0x21e   : > { %v2558_v58 = vpop.eup %2557  ;;  %v1224_v52 = vadd.f32 %v1192_v43, %v1160_v32  ;;  %v1733_v33 = vsub.f32 %v1635_v27, %v1411_v18  ;;  %2569 = vlog2.f32 %v1635_v27  ;;  %vm1640_vm7 = vcmp.eq.f32.partialorder %v3940_v57, 0.0  ;;  %v4335_v27 = vld [vmem:[#allocation20_spill] sm:$0xff] }
 0x21f   : > { %v2560_v56 = vpop.eup %2559  ;;  %v2067_v2 = vadd.f32 %v2066_v4, %v1923_v61  ;;  %v1848_v8 = vmul.f32 0.6931472, %v2558_v58  ;;  %v1641_v30 = vand.u32 2147483648, %v3940_v57  ;;  %2571 = vrsqrt.f32 %v3981_v49  ;;  %v4333_v61 = vld [vmem:[#allocation18_spill] sm:$0xff]  ;;  %v4334_v58 = vld [vmem:[#allocation19_spill] sm:$0xff] }
 0x220   : > { %v2562_v54 = vpop.eup %2561  ;;  %v1784_v59 = vmul.f32 0.6931472, %v2560_v56  ;;  %v1033_v4 = vmul.f32 %v3578_v7, %v3578_v7  ;;  %v1958_v29 = vmul.f32 %v1733_v33, %v1733_v33  ;;  %v2031_v63 = vadd.f32 %v2030_v25, %v3981_v49 }
 0x221   : > { %v2564_v16 = vpop.eup %2563  ;;  %v1413_v3 = vmul.f32 %v2562_v54, %v3938_v42  ;;  %vm1421_vm8 = vcmp.eq.f32.partialorder %v3966_v1, inf  ;;  %v3997_v35 = vmax.f32 %v1096_v0, 1e-07  ;;  %v3999_v31 = vmax.f32 %v1224_v52, 1e-07 }
 0x222   : > { %v1892_v45 = vsub.f32 %v1784_v59, %v1848_v8  ;;  %v1637_v10 = vmul.f32 %v2564_v16, %v3940_v57  ;;  %v1989_v18 = vadd.f32 %v1988_v21, %v1958_v29  ;;  %vm1423_vm9 = vcmp.eq.f32.partialorder %v3966_v1, 0.0 }
 0x223   : > { %v1415_v53 = vsel %vm1414_vm4, %v3938_v42, %v1413_v3  ;;  %v2566_v25 = vpop.eup %2565  ;;  %v1424_v37 = vand.u32 2147483648, %v3966_v1  ;;  %vm1645_vm10 = vcmp.eq.f32.partialorder %v3981_v49, inf  ;;  %vm1647_vm11 = vcmp.eq.f32.partialorder %v3981_v49, 0.0 }
 0x224   : > { %v1924_v15 = vand.u32 2147483647, %v1892_v45  ;;  %v1418_v7 = vsel %vm1416_vm5, %v1417_v51, %v1415_v53  ;;  %v1639_v11 = vsel %vm1638_vm6, %v3940_v57, %v1637_v10  ;;  %v1648_v21 = vand.u32 2147483648, %v3981_v49 }
 0x225   : > { %2573 = vlog2.f32 %v1418_v7  ;;  %v1642_v23 = vsel %vm1640_vm7, %v1641_v30, %v1639_v11  ;;  %v1161_v57 = vmul.f32 %v3580_v22, %v3580_v22  ;;  %v1850_v32 = vmul.f32 0.6931472, %v2566_v25 }
 0x226   : > { %v2068_v13 = vadd.f32 %v2067_v2, %v1924_v15  ;;  %v1734_v50 = vsub.f32 %v1642_v23, %v1418_v7  ;;  %2575 = vlog2.f32 %v1642_v23  ;;  %v2568_v42 = vpop.eup %2567  ;;  %v2032_v60 = vadd.f32 %v2031_v63, %v3999_v31 }
 0x227   : > { %2577 = vrsqrt.f32 %v3997_v35  ;;  %v1420_v12 = vmul.f32 %v2568_v42, %v3966_v1  ;;  %v1065_v34 = vmul.f32 %v3586_v24, %v3586_v24  ;;  %v1193_v20 = vmul.f32 %v3588_v62, %v3588_v62 }
 0x228   : > { %v1959_v40 = vmul.f32 %v1734_v50, %v1734_v50  ;;  %2579 = vrsqrt.f32 %v3999_v31  ;;  %v1034_v46 = vmul.f32 %v3596_v44, %v3596_v44  ;;  %v2570_v5 = vpop.eup %2569  ;;  %v1162_v51 = vmul.f32 %v4333_v61, %v4333_v61 }
 0x229   : > { %v1422_v22 = vsel %vm1421_vm8, %v3966_v1, %v1420_v12  ;;  %v1066_v19 = vmul.f32 %v4334_v58, %v4334_v58  ;;  %v2572_v0 = vpop.eup %2571  ;;  %v1786_v24 = vmul.f32 0.6931472, %v2570_v5  ;;  %v1097_v56 = vadd.f32 %v1065_v34, %v1033_v4 }
 0x22a   : > { %v1990_v43 = vadd.f32 %v1989_v18, %v1959_v40  ;;  %v1425_v62 = vsel %vm1423_vm9, %v1424_v37, %v1422_v22  ;;  %v1225_v2 = vadd.f32 %v1193_v20, %v1161_v57  ;;  %v1644_v44 = vmul.f32 %v2572_v0, %v3981_v49 }
 0x22b   : > { %2581 = vlog2.f32 %v1425_v62  ;;  %v1098_v8 = vadd.f32 %v1066_v19, %v1034_v46  ;;  %v1194_v52 = vmul.f32 %v4335_v27, %v4335_v27  ;;  %v1893_v54 = vsub.f32 %v1786_v24, %v1850_v32  ;;  %v4336_v24 = vld [vmem:[#allocation21_spill] sm:$0xff] }
 0x22c   : > { %vm1428_vm12 = vcmp.eq.f32.partialorder %v3997_v35, inf  ;;  %v4038_v59 = vmax.f32 %v1097_v56, 1e-07  ;;  %v4040_v33 = vmax.f32 %v1225_v2, 1e-07  ;;  %v1646_v1 = vsel %vm1645_vm10, %v3981_v49, %v1644_v44  ;;  %v4337_v56 = vld [vmem:[#allocation22_spill] sm:$0xff] }
 0x22d   : > { %vm1430_vm13 = vcmp.eq.f32.partialorder %v3997_v35, 0.0  ;;  %v1431_v16 = vand.u32 2147483648, %v3997_v35  ;;  %v1226_v3 = vadd.f32 %v1194_v52, %v1162_v51  ;;  %v1925_v4 = vand.u32 2147483647, %v1893_v54  ;;  %v4338_v44 = vld [vmem:[#allocation23_spill] sm:$0xff] }
 0x22e   : > { %v1649_v45 = vsel %vm1647_vm11, %v1648_v21, %v1646_v1  ;;  %vm1652_vm14 = vcmp.eq.f32.partialorder %v3999_v31, inf  ;;  %2583 = vrsqrt.f32 %v4038_v59  ;;  %v4051_v53 = vmax.f32 %v1098_v8, 1e-07 }
 0x22f   : > { %v2574_v30 = vpop.eup %2573  ;;  %v1735_v63 = vsub.f32 %v1649_v45, %v1425_v62  ;;  %2585 = vlog2.f32 %v1649_v45  ;;  %v2069_v18 = vadd.f32 %v2068_v13, %v1925_v4  ;;  %vm1654_vm15 = vcmp.eq.f32.partialorder %v3999_v31, 0.0 }
 0x230   : > { %v2576_v29 = vpop.eup %2575  ;;  %v1852_v10 = vmul.f32 0.6931472, %v2574_v30  ;;  %2587 = vrsqrt.f32 %v4040_v33  ;;  %v1655_v23 = vand.u32 2147483648, %v3999_v31  ;;  %v1035_v37 = vmul.f32 %v3625_v9, %v3625_v9  ;;  %v4339_v30 = vld [vmem:[#allocation24_spill] sm:$0xff] }
 0x231   : > { %v2578_v15 = vpop.eup %2577  ;;  %v1788_v7 = vmul.f32 0.6931472, %v2576_v29  ;;  %v1960_v49 = vmul.f32 %v1735_v63, %v1735_v63  ;;  %v2033_v21 = vadd.f32 %v2032_v60, %v4040_v33  ;;  %v1163_v13 = vmul.f32 %v3627_v6, %v3627_v6 }
 0x232   : > { %v2580_v11 = vpop.eup %2579  ;;  %v1427_v25 = vmul.f32 %v2578_v15, %v3997_v35  ;;  %vm1435_vm0 = vcmp.eq.f32.partialorder %v4038_v59, inf  ;;  %2589 = vrsqrt.f32 %v4051_v53  ;;  %vm1437_vm1 = vcmp.eq.f32.partialorder %v4038_v59, 0.0 }
 0x233   : > { %v1894_v50 = vsub.f32 %v1788_v7, %v1852_v10  ;;  %v1651_v42 = vmul.f32 %v2580_v11, %v3999_v31  ;;  %v1991_v57 = vadd.f32 %v1990_v43, %v1960_v49  ;;  %v1438_v34 = vand.u32 2147483648, %v4038_v59 }
 0x234   : > { %v1429_v32 = vsel %vm1428_vm12, %v3997_v35, %v1427_v25  ;;  %v4077_v20 = vmax.f32 %v1226_v3, 1e-07  ;;  %vm1659_vm2 = vcmp.eq.f32.partialorder %v4040_v33, inf  ;;  %vm1661_vm3 = vcmp.eq.f32.partialorder %v4040_v33, 0.0 }
 0x235   : > { %v1926_v40 = vand.u32 2147483647, %v1894_v50  ;;  %v1432_v9 = vsel %vm1430_vm13, %v1431_v16, %v1429_v32  ;;  %v1653_v12 = vsel %vm1652_vm14, %v3999_v31, %v1651_v42  ;;  %v2582_v6 = vpop.eup %2581  ;;  %v1662_v43 = vand.u32 2147483648, %v4040_v33 }
 0x236   : > { %2591 = vlog2.f32 %v1432_v9  ;;  %v1656_v60 = vsel %vm1654_vm15, %v1655_v23, %v1653_v12  ;;  %v1854_v35 = vmul.f32 0.6931472, %v2582_v6  ;;  %v2034_v31 = vadd.f32 %v2033_v21, %v4077_v20 }
 0x237   : > { %v2070_v46 = vadd.f32 %v2069_v18, %v1926_v40  ;;  %v1736_v5 = vsub.f32 %v1656_v60, %v1432_v9  ;;  %2593 = vlog2.f32 %v1656_v60  ;;  %v1067_v51 = vmul.f32 %v3631_v39, %v3631_v39 }
 0x238   : > { %2595 = vrsqrt.f32 %v4077_v20  ;;  %v2584_v22 = vpop.eup %2583  ;;  %v1195_v58 = vmul.f32 %v3633_v14, %v3633_v14  ;;  %v1036_v62 = vmul.f32 %v4336_v24, %v4336_v24  ;;  %v1164_v2 = vmul.f32 %v4337_v56, %v4337_v56 }
 0x239   : > { %v1961_v61 = vmul.f32 %v1736_v5, %v1736_v5  ;;  %v2586_v19 = vpop.eup %2585  ;;  %v1434_v0 = vmul.f32 %v2584_v22, %v4038_v59  ;;  %v1068_v8 = vmul.f32 %v4338_v44, %v4338_v44  ;;  %v1099_v1 = vadd.f32 %v1067_v51, %v1035_v37 }
 0x23a   : > { %v2588_v27 = vpop.eup %2587  ;;  %v1790_v52 = vmul.f32 0.6931472, %v2586_v19  ;;  %v1227_v39 = vadd.f32 %v1195_v58, %v1163_v13  ;;  %v1196_v4 = vmul.f32 %v4339_v30, %v4339_v30  ;;  %vm1442_vm4 = vcmp.eq.f32.partialorder %v4051_v53, inf }
 0x23b   : > { %v1992_v54 = vadd.f32 %v1991_v57, %v1961_v61  ;;  %v1436_v14 = vsel %vm1435_vm0, %v4038_v59, %v1434_v0  ;;  %v1658_v16 = vmul.f32 %v2588_v27, %v4040_v33  ;;  %v1100_v3 = vadd.f32 %v1068_v8, %v1036_v62  ;;  %v4340_v8 = vld [vmem:[#allocation25_spill] sm:$0xff] }
 0x23c   : > { %v1895_v45 = vsub.f32 %v1790_v52, %v1854_v35  ;;  %v1439_v29 = vsel %vm1437_vm1, %v1438_v34, %v1436_v14  ;;  %v4104_v10 = vmax.f32 %v1099_v1, 1e-07  ;;  %v2590_v63 = vpop.eup %2589  ;;  %v4109_v18 = vmax.f32 %v1227_v39, 1e-07  ;;  %v4341_v52 = vld [vmem:[#allocation26_spill] sm:$0xff]  ;;  %v4343_v14 = vld [vmem:[#allocation28_spill] sm:$0xff] }
 0x23d   : > { %2597 = vlog2.f32 %v1439_v29  ;;  %v1660_v15 = vsel %vm1659_vm2, %v4040_v33, %v1658_v16  ;;  %v1228_v7 = vadd.f32 %v1196_v4, %v1164_v2  ;;  %v1441_v59 = vmul.f32 %v2590_v63, %v4051_v53 }
 0x23e   : > { %v1927_v11 = vand.u32 2147483647, %v1895_v45  ;;  %v1663_v49 = vsel %vm1661_vm3, %v1662_v43, %v1660_v15  ;;  %2599 = vrsqrt.f32 %v4104_v10  ;;  %vm1444_vm5 = vcmp.eq.f32.partialorder %v4051_v53, 0.0 }
 0x23f   : > { %v1737_v23 = vsub.f32 %v1663_v49, %v1439_v29  ;;  %2601 = vlog2.f32 %v1663_v49  ;;  %v1445_v37 = vand.u32 2147483648, %v4051_v53  ;;  %v1443_v13 = vsel %vm1442_vm4, %v4051_v53, %v1441_v59 }
 0x240   : > { %v2592_v25 = vpop.eup %2591  ;;  %v2071_v42 = vadd.f32 %v2070_v46, %v1927_v11  ;;  %v4120_v33 = vmax.f32 %v1100_v3, 1e-07  ;;  %2603 = vrsqrt.f32 %v4109_v18  ;;  %vm1666_vm6 = vcmp.eq.f32.partialorder %v4077_v20, inf }
 0x241   : > { %v2594_v50 = vpop.eup %2593  ;;  %v1856_v21 = vmul.f32 0.6931472, %v2592_v25  ;;  %v1962_v40 = vmul.f32 %v1737_v23, %v1737_v23  ;;  %v1446_v9 = vsel %vm1444_vm5, %v1445_v37, %v1443_v13  ;;  %vm1668_vm7 = vcmp.eq.f32.partialorder %v4077_v20, 0.0 }
 0x242   : > { %v2596_v57 = vpop.eup %2595  ;;  %v1792_v32 = vmul.f32 0.6931472, %v2594_v50  ;;  %2605 = vlog2.f32 %v1446_v9  ;;  %v1669_v34 = vand.u32 2147483648, %v4077_v20  ;;  %v2035_v53 = vadd.f32 %v2034_v31, %v4109_v18 }
 0x243   : > { %v1665_v12 = vmul.f32 %v2596_v57, %v4077_v20  ;;  %v1993_v60 = vadd.f32 %v1992_v54, %v1962_v40  ;;  %vm1449_vm8 = vcmp.eq.f32.partialorder %v4104_v10, inf  ;;  %vm1451_vm9 = vcmp.eq.f32.partialorder %v4104_v10, 0.0 }
 0x244   : > { %v1896_v6 = vsub.f32 %v1792_v32, %v1856_v21  ;;  %2607 = vrsqrt.f32 %v4120_v33  ;;  %v1452_v43 = vand.u32 2147483648, %v4104_v10  ;;  %v4133_v22 = vmax.f32 %v1228_v7, 1e-07 }
 0x245   : > { %v1667_v46 = vsel %vm1666_vm6, %v4077_v20, %v1665_v12  ;;  %vm1673_vm10 = vcmp.eq.f32.partialorder %v4109_v18, inf  ;;  %vm1675_vm11 = vcmp.eq.f32.partialorder %v4109_v18, 0.0  ;;  %v1037_v51 = vmul.f32 %v3669_v48, %v3669_v48  ;;  %v4342_v48 = vld [vmem:[#allocation27_spill] sm:$0xff] }
 0x246   : > { %v1928_v5 = vand.u32 2147483647, %v1896_v6  ;;  %v1670_v35 = vsel %vm1668_vm7, %v1669_v34, %v1667_v46  ;;  %v1165_v58 = vmul.f32 %v3671_v38, %v3671_v38  ;;  %v1676_v62 = vand.u32 2147483648, %v4109_v18 }
 0x247   : > { %v1738_v61 = vsub.f32 %v1670_v35, %v1446_v9  ;;  %2609 = vlog2.f32 %v1670_v35  ;;  %v2598_v31 = vpop.eup %2597  ;;  %v2036_v56 = vadd.f32 %v2035_v53, %v4133_v22  ;;  %v1069_v27 = vmul.f32 %v4340_v8, %v4340_v8 }
 0x248   : > { %v2072_v20 = vadd.f32 %v2071_v42, %v1928_v5  ;;  %2611 = vrsqrt.f32 %v4133_v22  ;;  %v2600_v19 = vpop.eup %2599  ;;  %v1858_v0 = vmul.f32 0.6931472, %v2598_v31  ;;  %v1197_v54 = vmul.f32 %v4341_v52, %v4341_v52 }
 0x249   : > { %v1963_v24 = vmul.f32 %v1738_v61, %v1738_v61  ;;  %v2602_v2 = vpop.eup %2601  ;;  %v1448_v44 = vmul.f32 %v2600_v19, %v4104_v10  ;;  %v1038_v1 = vmul.f32 %v4342_v48, %v4342_v48  ;;  %v1166_v16 = vmul.f32 %v4343_v14, %v4343_v14 }
 0x24a   : > { %v1794_v38 = vmul.f32 0.6931472, %v2602_v2  ;;  %v1070_v3 = vmul.f32 %v3695_v17, %v3695_v17  ;;  %v2604_v30 = vpop.eup %2603  ;;  %v1101_v45 = vadd.f32 %v1069_v27, %v1037_v51  ;;  %v1229_v29 = vadd.f32 %v1197_v54, %v1165_v58 }
 0x24b   : > { %v1994_v39 = vadd.f32 %v1993_v60, %v1963_v24  ;;  %v1450_v4 = vsel %vm1449_vm8, %v4104_v10, %v1448_v44  ;;  %v1198_v63 = vmul.f32 %v3697_v36, %v3697_v36  ;;  %v1672_v49 = vmul.f32 %v2604_v30, %v4109_v18 }
 0x24c   : > { %v2606_v15 = vpop.eup %2605  ;;  %v1897_v7 = vsub.f32 %v1794_v38, %v1858_v0  ;;  %v1453_v11 = vsel %vm1451_vm9, %v1452_v43, %v1450_v4  ;;  %v1102_v59 = vadd.f32 %v1070_v3, %v1038_v1  ;;  %vm1456_vm12 = vcmp.eq.f32.partialorder %v4120_v33, inf }
 0x24d   : > { %2613 = vlog2.f32 %v1453_v11  ;;  %v4164_v17 = vmax.f32 %v1101_v45, 1e-07  ;;  %v4166_v25 = vmax.f32 %v1229_v29, 1e-07  ;;  %v1674_v36 = vsel %vm1673_vm10, %v4109_v18, %v1672_v49 }
 0x24e   : > { %v2608_v23 = vpop.eup %2607  ;;  %v1929_v37 = vand.u32 2147483647, %v1897_v7  ;;  %v1459_v10 = vand.u32 2147483648, %v4120_v33  ;;  %v1230_v50 = vadd.f32 %v1198_v63, %v1166_v16  ;;  %v1860_v42 = vmul.f32 0.6931472, %v2606_v15 }
 0x24f   : > { %v1677_v21 = vsel %vm1675_vm11, %v1676_v62, %v1674_v36  ;;  %v1455_v13 = vmul.f32 %v2608_v23, %v4120_v33  ;;  %2615 = vrsqrt.f32 %v4164_v17  ;;  %v4177_v9 = vmax.f32 %v1102_v59, 1e-07 }
 0x250   : > { %v2073_v32 = vadd.f32 %v2072_v20, %v1929_v37  ;;  %v1739_v40 = vsub.f32 %v1677_v21, %v1453_v11  ;;  %2617 = vlog2.f32 %v1677_v21  ;;  %vm1458_vm13 = vcmp.eq.f32.partialorder %v4120_v33, 0.0  ;;  %v4345_v11 = vld [vmem:[#allocation30_spill] sm:$0xff] }
 0x251   : > { %v2610_v57 = vpop.eup %2609  ;;  %v1457_v18 = vsel %vm1456_vm12, %v4120_v33, %v1455_v13  ;;  %2619 = vrsqrt.f32 %v4166_v25  ;;  %vm1680_vm14 = vcmp.eq.f32.partialorder %v4133_v22, inf  ;;  %vm1682_vm15 = vcmp.eq.f32.partialorder %v4133_v22, 0.0 }
 0x252   : > { %v2612_v12 = vpop.eup %2611  ;;  %v1796_v6 = vmul.f32 0.6931472, %v2610_v57  ;;  %v1964_v60 = vmul.f32 %v1739_v40, %v1739_v40  ;;  %v1460_v34 = vsel %vm1458_vm13, %v1459_v10, %v1457_v18  ;;  %v1683_v5 = vand.u32 2147483648, %v4133_v22 }
 0x253   : > { %v1679_v53 = vmul.f32 %v2612_v12, %v4133_v22  ;;  %2621 = vlog2.f32 %v1460_v34  ;;  %v2037_v43 = vadd.f32 %v2036_v56, %v4166_v25  ;;  %vm1463_vm0 = vcmp.eq.f32.partialorder %v4164_v17, inf }
 0x254   : > { %v1898_v46 = vsub.f32 %v1796_v6, %v1860_v42  ;;  %v1995_v35 = vadd.f32 %v1994_v39, %v1964_v60  ;;  %2623 = vrsqrt.f32 %v4177_v9  ;;  %vm1465_vm1 = vcmp.eq.f32.partialorder %v4164_v17, 0.0  ;;  %v4344_v39 = vld [vmem:[#allocation29_spill] sm:$0xff] }
 0x255   : > { %v1681_v33 = vsel %vm1680_vm14, %v4133_v22, %v1679_v53  ;;  %v1466_v51 = vand.u32 2147483648, %v4164_v17  ;;  %v4199_v58 = vmax.f32 %v1230_v50, 1e-07  ;;  %vm1687_vm2 = vcmp.eq.f32.partialorder %v4166_v25, inf }
 0x256   : > { %v1930_v61 = vand.u32 2147483647, %v1898_v46  ;;  %v1684_v31 = vsel %vm1682_vm15, %v1683_v5, %v1681_v33  ;;  %v1039_v22 = vmul.f32 %v3717_v41, %v3717_v41  ;;  %v1071_v24 = vmul.f32 %v3725_v28, %v3725_v28 }
 0x257   : > { %v1740_v20 = vsub.f32 %v1684_v31, %v1460_v34  ;;  %2625 = vlog2.f32 %v1684_v31  ;;  %v2614_v19 = vpop.eup %2613  ;;  %vm1689_vm3 = vcmp.eq.f32.partialorder %v4166_v25, 0.0  ;;  %v1167_v56 = vmul.f32 %v3719_v55, %v3719_v55 }
 0x258   : > { %v2074_v0 = vadd.f32 %v2073_v32, %v1930_v61  ;;  %2627 = vrsqrt.f32 %v4199_v58  ;;  %v1862_v44 = vmul.f32 0.6931472, %v2614_v19  ;;  %v1690_v8 = vand.u32 2147483648, %v4166_v25  ;;  %v4346_v32 = vld [vmem:[#allocation31_spill] sm:$0xff] }
 0x259   : > { %v1965_v62 = vmul.f32 %v1740_v20, %v1740_v20  ;;  %v2616_v2 = vpop.eup %2615  ;;  %v2038_v27 = vadd.f32 %v2037_v43, %v4199_v58  ;;  %v1103_v52 = vadd.f32 %v1071_v24, %v1039_v22  ;;  %vm1470_vm4 = vcmp.eq.f32.partialorder %v4177_v9, inf }
 0x25a   : > { %v2618_v41 = vpop.eup %2617  ;;  %v1462_v28 = vmul.f32 %v2616_v2, %v4164_v17  ;;  %v1199_v48 = vmul.f32 %v3727_v47, %v3727_v47  ;;  %v1040_v14 = vmul.f32 %v4344_v39, %v4344_v39  ;;  %v1072_v16 = vmul.f32 %v3741_v26, %v3741_v26 }
 0x25b   : > { %v1996_v54 = vadd.f32 %v1995_v35, %v1965_v62  ;;  %v2620_v55 = vpop.eup %2619  ;;  %v1798_v1 = vmul.f32 0.6931472, %v2618_v41  ;;  %v4222_v38 = vmax.f32 %v1103_v52, 1e-07  ;;  %vm1472_vm5 = vcmp.eq.f32.partialorder %v4177_v9, 0.0 }
 0x25c   : > { %v1464_v47 = vsel %vm1463_vm0, %v4164_v17, %v1462_v28  ;;  %v1686_v3 = vmul.f32 %v2620_v55, %v4166_v25  ;;  %v1231_v30 = vadd.f32 %v1199_v48, %v1167_v56  ;;  %v2809_v63 = vmov 0.0  }
 0x25d   : > { %v2622_v4 = vpop.eup %2621  ;;  %v1899_v45 = vsub.f32 %v1798_v1, %v1862_v44  ;;  %v1467_v29 = vsel %vm1465_vm1, %v1466_v51, %v1464_v47  ;;  %2629 = vrsqrt.f32 %v4222_v38  ;;  %270 = vst [vmem:[%s4220_s20] sm:$0x7] %v2809_v63  ;;  %v1473_v7 = vand.u32 2147483648, %v4177_v9 }
 0x25e   : > { %v2624_v15 = vpop.eup %2623  ;;  %2631 = vlog2.f32 %v1467_v29  ;;  %v1688_v26 = vsel %vm1687_vm2, %v4166_v25, %v1686_v3  ;;  %v1168_v49 = vmul.f32 %v4345_v11, %v4345_v11  ;;  %v1864_v17 = vmul.f32 0.6931472, %v2622_v4 }
 0x25f   : > { %v1931_v59 = vand.u32 2147483647, %v1899_v45  ;;  %v1691_v23 = vsel %vm1689_vm3, %v1690_v8, %v1688_v26  ;;  %v1469_v37 = vmul.f32 %v2624_v15, %v4177_v9  ;;  %v1263_v50 = vmax.f32 %v1231_v30, 1e-07 }
 0x260   : > { %v1741_v10 = vsub.f32 %v1691_v23, %v1467_v29  ;;  %2633 = vlog2.f32 %v1691_v23  ;;  %v1104_v42 = vadd.f32 %v1072_v16, %v1040_v14  ;;  %v1200_v40 = vmul.f32 %v4346_v32, %v4346_v32 }
 0x261   : > { %v2626_v36 = vpop.eup %2625  ;;  %v2075_v21 = vadd.f32 %v2074_v0, %v1931_v59  ;;  %v1471_v57 = vsel %vm1470_vm4, %v4177_v9, %v1469_v37  ;;  %2635 = vrsqrt.f32 %v1263_v50  ;;  %vm1694_vm6 = vcmp.eq.f32.partialorder %v4199_v58, inf }
 0x262   : > { %v1800_v13 = vmul.f32 0.6931472, %v2626_v36  ;;  %v2628_v12 = vpop.eup %2627  ;;  %v1966_v6 = vmul.f32 %v1741_v10, %v1741_v10  ;;  %v1474_v25 = vsel %vm1472_vm5, %v1473_v7, %v1471_v57  ;;  %v1697_v53 = vand.u32 2147483648, %v4199_v58 }
 0x263   : > { %2637 = vlog2.f32 %v1474_v25  ;;  %v1693_v60 = vmul.f32 %v2628_v12, %v4199_v58  ;;  %v2039_v46 = vadd.f32 %v2038_v27, %v1263_v50  ;;  %v1136_v5 = vmax.f32 %v1104_v42, 1e-07 }
 0x264   : > { %v1900_v18 = vsub.f32 %v1800_v13, %v1864_v17  ;;  %v1997_v34 = vadd.f32 %v1996_v54, %v1966_v6  ;;  %vm1696_vm7 = vcmp.eq.f32.partialorder %v4199_v58, 0.0  ;;  %v1232_v43 = vadd.f32 %v1200_v40, %v1168_v49  ;;  %v2009_v13 = vld [vmem:[%s4220_s20 + $0x1] sm:$0x1] }
 0x265   : > { %v1695_v33 = vsel %vm1694_vm6, %v4199_v58, %v1693_v60  ;;  %2639 = vrsqrt.f32 %v1136_v5  ;;  %vm1477_vm8 = vcmp.eq.f32.partialorder %v4222_v38, inf  ;;  %v1480_v62 = vand.u32 2147483648, %v4222_v38 }
 0x266   : > { %v1932_v35 = vand.u32 2147483647, %v1900_v18  ;;  %v1698_v9 = vsel %vm1696_vm7, %v1697_v53, %v1695_v33  ;;  %v1264_v0 = vmax.f32 %v1232_v43, 1e-07  ;;  %vm1479_vm9 = vcmp.eq.f32.partialorder %v4222_v38, 0.0 }
 0x267   : > { %v2630_v61 = vpop.eup %2629  ;;  %v1742_v20 = vsub.f32 %v1698_v9, %v1474_v25  ;;  %2641 = vlog2.f32 %v1698_v9  ;;  %vm1701_vm10 = vcmp.eq.f32.partialorder %v1263_v50, inf  ;;  %v1704_v48 = vand.u32 2147483648, %v1263_v50 }
 0x268   : > { %v2076_v31 = vadd.f32 %v2075_v21, %v1932_v35  ;;  %v2632_v51 = vpop.eup %2631  ;;  %v1476_v19 = vmul.f32 %v2630_v61, %v4222_v38  ;;  %2643 = vrsqrt.f32 %v1264_v0  ;;  %v2040_v52 = vadd.f32 %v2039_v46, %v1264_v0 }
 0x269   : > { %v1866_v22 = vmul.f32 0.6931472, %v2632_v51  ;;  %v1967_v24 = vmul.f32 %v1742_v20, %v1742_v20  ;;  %vm1703_vm11 = vcmp.eq.f32.partialorder %v1263_v50, 0.0  ;;  %vm1484_vm12 = vcmp.eq.f32.partialorder %v1136_v5, inf }
 0x26a   : > { %v2634_v56 = vpop.eup %2633  ;;  %v1478_v58 = vsel %vm1477_vm8, %v4222_v38, %v1476_v19  ;;  %v2041_v55 = vrot.slane %v2040_v52, 4  ;;  %v1487_v63 = vand.u32 2147483648, %v1136_v5  ;;  %vm1486_vm13 = vcmp.eq.f32.partialorder %v1136_v5, 0.0 }
 0x26b   : > { %v1802_v2 = vmul.f32 0.6931472, %v2634_v56  ;;  %v1998_v44 = vadd.f32 %v1997_v34, %v1967_v24  ;;  %v1481_v8 = vsel %vm1479_vm9, %v1480_v62, %v1478_v58  ;;  %v2636_v27 = vpop.eup %2635  ;;  %vm1708_vm14 = vcmp.eq.f32.partialorder %v1264_v0, inf  ;;  %v1937_v62 = vld [vmem:[%s4220_s20] sm:$0x1] }
 0x26c   : > { %2645 = vlog2.f32 %v1481_v8  ;;  %v1700_v28 = vmul.f32 %v2636_v27, %v1263_v50  ;;  %v2042_v38 = vadd.f32 %v2041_v55, %v2040_v52  ;;  %v1711_v10 = vand.u32 2147483648, %v1264_v0 }
 0x26d   : > { %v2638_v41 = vpop.eup %2637  ;;  %v1901_v54 = vsub.f32 %v1802_v2, %v1866_v22  ;;  %vm1710_vm15 = vcmp.eq.f32.partialorder %v1264_v0, 0.0 }
 0x26e   : > { %v1702_v39 = vsel %vm1701_vm10, %v1263_v50, %v1700_v28  ;;  %v1868_v16 = vmul.f32 0.6931472, %v2638_v41  ;;  %v2043_v15 = vrot.slane %v2042_v38, 2 }
 0x26f   : > { %v1933_v1 = vand.u32 2147483647, %v1901_v54  ;;  %v2640_v14 = vpop.eup %2639  ;;  %v1705_v47 = vsel %vm1703_vm11, %v1704_v48, %v1702_v39  ;;  %v2049_v54 = vld [vmem:[%s4220_s20 + $0x2] sm:$0x1] }
 0x270   : > { %v1743_v4 = vsub.f32 %v1705_v47, %v1481_v8  ;;  %2647 = vlog2.f32 %v1705_v47  ;;  %v1483_v45 = vmul.f32 %v2640_v14, %v1136_v5  ;;  %v2044_v17 = vadd.f32 %v2043_v15, %v2042_v38 }
 0x271   : > { %v2642_v3 = vpop.eup %2641  ;;  %v2077_v30 = vadd.f32 %v2076_v31, %v1933_v1 }
 0x272   : > { %v1804_v29 = vmul.f32 0.6931472, %v2642_v3  ;;  %v1968_v26 = vmul.f32 %v1743_v4, %v1743_v4  ;;  %v1485_v7 = vsel %vm1484_vm12, %v1136_v5, %v1483_v45  ;;  %v2644_v11 = vpop.eup %2643  ;;  %v2045_v50 = vrot.slane %v2044_v17, 1 }
 0x273   : > { %v1488_v59 = vsel %vm1486_vm13, %v1487_v63, %v1485_v7  ;;  %v1707_v37 = vmul.f32 %v2644_v11, %v1264_v0 }
 0x274   : > { %v1902_v49 = vsub.f32 %v1804_v29, %v1868_v16  ;;  %v1999_v23 = vadd.f32 %v1998_v44, %v1968_v26  ;;  %2649 = vlog2.f32 %v1488_v59  ;;  %v2046_v40 = vadd.f32 %v2045_v50, %v2044_v17 }
 0x275   : > { %v1709_v21 = vsel %vm1708_vm14, %v1264_v0, %v1707_v37 }
 0x276   : > { %v1934_v36 = vand.u32 2147483647, %v1902_v49  ;;  %v2646_v42 = vpop.eup %2645  ;;  %v1712_v32 = vsel %vm1710_vm15, %v1711_v10, %v1709_v21  ;;  %v2047_v25 = vadd.f32 %v2046_v40, %v2009_v13 }
 0x277   : > { %v1744_v12 = vsub.f32 %v1712_v32, %v1488_v59  ;;  %2651 = vlog2.f32 %v1712_v32  ;;  %v1870_v6 = vmul.f32 0.6931472, %v2646_v42 }
 0x278   : > { %v2078_v57 = vadd.f32 %v2077_v30, %v1934_v36  ;;  %2048 = vst [vmem:[%s4220_s20 + $0x1] sm:$0x1] %v2047_v25 }
 0x279   : > { %v1969_v60 = vmul.f32 %v1744_v12, %v1744_v12 }
 0x27a   : > { %v2648_v18 = vpop.eup %2647 }
 0x27b   : > { %v1806_v34 = vmul.f32 0.6931472, %v2648_v18  ;;  %v2000_v53 = vadd.f32 %v1999_v23, %v1969_v60 }
 0x27d   : > { %v1903_v46 = vsub.f32 %v1806_v34, %v1870_v6  ;;  %v2001_v35 = vrot.slane %v2000_v53, 4 }
 0x27e   : > { %v2650_v5 = vpop.eup %2649 }
 0x27f   : > { %v1935_v33 = vand.u32 2147483647, %v1903_v46  ;;  %v2002_v43 = vadd.f32 %v2001_v35, %v2000_v53  ;;  %v1872_v61 = vmul.f32 0.6931472, %v2650_v5 }
 0x281   : > { %v2079_v9 = vadd.f32 %v2078_v57, %v1935_v33  ;;  %v2652_v31 = vpop.eup %2651  ;;  %v2003_v20 = vrot.slane %v2002_v43, 2 }
 0x282   : > { %v1808_v51 = vmul.f32 0.6931472, %v2652_v31 }
 0x283   : > { %v2004_v19 = vadd.f32 %v2003_v20, %v2002_v43 }
 0x284   : > { %v1904_v0 = vsub.f32 %v1808_v51, %v1872_v61 }
 0x285   : > { %v2005_v22 = vrot.slane %v2004_v19, 1 }
 0x286   : > { %v1936_v24 = vand.u32 2147483647, %v1904_v0 }
 0x287   : > { %v2006_v56 = vadd.f32 %v2005_v22, %v2004_v19 }
 0x288   : > { %v2080_v58 = vadd.f32 %v2079_v9, %v1936_v24 }
 0x289   : > { %v2007_v2 = vadd.f32 %v2006_v56, %v1937_v62 }
 0x28a   : > { %v2081_v44 = vrot.slane %v2080_v58, 4 }
 0x28b   : > { %2008 = vst [vmem:[%s4220_s20] sm:$0x1] %v2007_v2 }
 0x28c   : > { %v2082_v8 = vadd.f32 %v2081_v44, %v2080_v58 }
 0x28e   : > { %v2083_v27 = vrot.slane %v2082_v8, 2 }
 0x290   : > { %v2084_v52 = vadd.f32 %v2083_v27, %v2082_v8 }
 0x292   : > { %v2085_v41 = vrot.slane %v2084_v52, 1 }
 0x294   : > { %v2086_v28 = vadd.f32 %v2085_v41, %v2084_v52 }
 0x296   : > { %v2087_v48 = vadd.f32 %v2086_v28, %v2049_v54 }
 0x298   : > { %2088 = vst [vmem:[%s4220_s20 + $0x2] sm:$0x1] %v2087_v48 }
 0x299 PF: > { %s19_s17 = sadd.s32 1, %s2799_s17   ;;  %s4347_s12 = smov %s2783_s13 }
 0x29a   : > { %p16_p9 = scmp.ge.s32.totalorder %s19_s17, 4   ;;  %s4348_s13 = smov %s2787_s14 }
 0x29b   : > { %s4349_s14 = smov %s2917_s27  ;;  %s4350_s15 = smov %s2795_s16 }
 0x29c   : > { %s4351_s16 = smov %s4353_s25  ;;  %18 = sbr.rel (!%p16_p9) target bundleno = 6 (0x6), region = 93 }
 0x2a3   :  { %2108 = vsyncpa [#allocation3], 1 }
 0x2a4   :  { %2110 = vsyncpa [#allocation3 + $0x1], 1 }
 0x2a5   :  { %2111 = vsyncpa [#allocation5], 1 }
 0x2a6   :  { %2113 = vsyncpa [#allocation5 + $0x1], 1 }

</bundles_post_ra>
